<compile_context>
chip_gen: v5e
topology: v5e:2x2
jax: 0.10.0
libtpu: 0.0.40
codegen_flags: <defaults>
</compile_context>

<pallas_src>
import functools

import jax
import jax.numpy as jnp
from jax.experimental import pallas as pl
from jax.experimental.pallas import tpu as pltpu

HIDDEN_SIZE = 60
HIDDEN_PAD = 128           # H padded to one full vreg lane width
INPUT_SIZE = 1
OUTPUT_SIZE = 1
NUM_LAYERS = 1             # single layer (matches module config)


def _sigmoid_via_tanh(x):
    # sigmoid(x) == 0.5 * tanh(0.5 * x) + 0.5 (exact identity); one EUP op
    # instead of exp + reciprocal.
    return 0.5 * jnp.tanh(0.5 * x) + 0.5


def _lstm_block_kernel(xproj_ref, whh_ref, h_out_ref, h_scr, c_scr, *, tb, unroll):
    """Runs `tb` LSTM timesteps per (batch-block, time-block) grid step.

    xproj_ref : (tb, bb, 4*HP) f32  precomputed x_t @ W_ih^T + (b_ih+b_hh), gate-padded
    whh_ref   : (HP, 4*HP)     W_hh^T, zero-padded (bf16 by default)
    h_out_ref : (tb, bb, HP)   f32  hidden state for every timestep (lane-dense)
    h_scr/c_scr : (bb, HP)     f32  recurrent carry, persists across time blocks
    """
    HP = HIDDEN_PAD

    # Zero initial hidden / cell state at the first time block of each batch block
    # (the module passes None to the LSTM).
    @pl.when(pl.program_id(1) == 0)
    def _():
        h_scr[...] = jnp.zeros_like(h_scr)
        c_scr[...] = jnp.zeros_like(c_scr)

    def step(i, carry):
        h_prev, c_prev = carry                   # register-carried, no VMEM round-trip

        # Only the recurrent matmul remains on the serial critical path.
        gates = xproj_ref[i] + jnp.dot(
            h_prev.astype(whh_ref.dtype), whh_ref[...],
            preferred_element_type=jnp.float32)  # (bb, 4*HP)

        # PyTorch gate ordering i, f, g, o; slices are 128-lane aligned.
        i_g = _sigmoid_via_tanh(gates[:, 0 * HP:1 * HP])
        f_g = _sigmoid_via_tanh(gates[:, 1 * HP:2 * HP])
        g_g = jnp.tanh(gates[:, 2 * HP:3 * HP])
        o_g = _sigmoid_via_tanh(gates[:, 3 * HP:4 * HP])

        c_new = f_g * c_prev + i_g * g_g
        h_new = o_g * jnp.tanh(c_new)

        h_out_ref[i] = h_new                     # lane-dense (bb, 128) store
        return (h_new, c_new)

    # h/c stay in vregs inside the loop; scratch is touched once per block so the
    # carry still persists across grid steps along the time axis.
    h_fin, c_fin = jax.lax.fori_loop(0, tb, step, (h_scr[...], c_scr[...]),
                                     unroll=unroll)
    h_scr[...] = h_fin
    c_scr[...] = c_fin


def lstm_reg_forward(x, params, *, tb_max=512,
                     vmem_block_budget=10 * 1024 * 1024,
                     recurrent_dtype=jnp.bfloat16):
    """x: (T, B, I) float32.  Returns (T, B, O) float32."""
    T, B, _ = x.shape
    H, HP = HIDDEN_SIZE, HIDDEN_PAD

    # ---- glue, runs once in XLA (no recurrence) ----------------------------
    bias = params["b_ih"] + params["b_hh"]                     # (4H,)
    xproj = x @ params["w_ih"].T + bias                        # (T, B, 4H)

    # Gate-wise padding [i|f|g|o], each gate padded H -> HP with zeros.
    xproj_p = jnp.pad(
        xproj.reshape(T, B, 4, H),
        ((0, 0), (0, 0), (0, 0), (0, HP - H))).reshape(T, B, 4 * HP)
    whh_p = jnp.pad(
        params["w_hh"].T.reshape(H, 4, H),
        ((0, HP - H), (0, 0), (0, HP - H))).reshape(HP, 4 * HP)
    whh_p = whh_p.astype(recurrent_dtype)

    # ---- batch blocking (leading "parallel" axis: lets v7x's 2 TCs split B) ---
    if B >= 16:
        bb = ((B + 1) // 2 + 7) // 8 * 8         # ~half the batch, sublane-aligned
        n_bb = -(-B // bb)
    else:
        bb, n_bb = B, 1                          # full-dim block, no alignment needed
    Bp = n_bb * bb
    if Bp != B:
        # Padded batch rows evolve independently and are sliced off afterwards.
        xproj_p = jnp.pad(xproj_p, ((0, 0), (0, Bp - B), (0, 0)))

    # ---- time blocking: biggest block within the VMEM budget, nearly dividing T
    b_rows = -(-bb // 8) * 8                     # sublane-padded rows per batch block
    # double-buffered xproj block + double-buffered hidden-state output block
    bytes_per_step = 2 * b_rows * 4 * HP * 4 + 2 * b_rows * HP * 4
    tb_cap = int(max(8, min(tb_max, vmem_block_budget // bytes_per_step)))
    n_tb = max(1, -(-T // tb_cap))
    tb = -(-T // n_tb)                           # wasted padded tail steps < n_tb
    Tp = n_tb * tb
    if Tp != T:
        # Trailing zero-padded timesteps update h/c past the real sequence but
        # their outputs are discarded, so results are unaffected.
        xproj_p = jnp.pad(xproj_p, ((0, Tp - T), (0, 0), (0, 0)))

    kernel = functools.partial(_lstm_block_kernel, tb=tb, unroll=min(tb, 8))

    vmem_need = (tb * bytes_per_step
                 + 2 * HP * 4 * HP * jnp.dtype(recurrent_dtype).itemsize
                 + 2 * b_rows * HP * 4)
    vmem_limit = int(min(32 * 1024 * 1024, max(16 * 1024 * 1024, 2 * vmem_need)))

    grid_spec = pltpu.PrefetchScalarGridSpec(
        num_scalar_prefetch=0,
        grid=(n_bb, n_tb),
        in_specs=[
            pl.BlockSpec((tb, bb, 4 * HP), lambda bi, ti: (ti, bi, 0)),  # gate pre-acts
            # Constant block index: Pallas keeps W_hh^T resident, no per-step re-DMA.
            pl.BlockSpec((HP, 4 * HP), lambda bi, ti: (0, 0)),
        ],
        out_specs=pl.BlockSpec((tb, bb, HP), lambda bi, ti: (ti, bi, 0)),
        scratch_shapes=[
            pltpu.VMEM((bb, HP), jnp.float32),   # h carry
            pltpu.VMEM((bb, HP), jnp.float32),   # c carry
        ],
    )

    h_pad = pl.pallas_call(
        kernel,
        out_shape=jax.ShapeDtypeStruct((Tp, Bp, HP), jnp.float32),
        grid_spec=grid_spec,
        compiler_params=pltpu.CompilerParams(
            dimension_semantics=("parallel", "arbitrary"),  # batch parallel, time in order
            vmem_limit_bytes=vmem_limit,
        ),
    )(xproj_p, whh_p)

    # Regression head on the padded (lane-dense) hidden tensor: zero-padded
    # hidden lanes meet zero-padded weight columns, so results are unchanged,
    # and we avoid materializing a lane-misaligned (T, B, 60) copy.
    w_reg_pad = jnp.pad(params["w_reg"], ((0, 0), (0, HP - H)))   # (O, HP)
    return h_pad[:T, :B, :] @ w_reg_pad.T + params["b_reg"]


def init_params(key, input_size=INPUT_SIZE, hidden_size=HIDDEN_SIZE,
                output_size=OUTPUT_SIZE):
    """Deterministic synthetic init mirroring PyTorch uniform(-1/sqrt(H), 1/sqrt(H))."""
    H = hidden_size
    ks = jax.random.split(key, 6)
    bound = 1.0 / jnp.sqrt(H)
    u = lambda k, shape: jax.random.uniform(k, shape, jnp.float32, -bound, bound)
    return {
        "w_ih": u(ks[0], (4 * H, input_size)),
        "w_hh": u(ks[1], (4 * H, H)),
        "b_ih": u(ks[2], (4 * H,)),
        "b_hh": u(ks[3], (4 * H,)),
        "w_reg": u(ks[4], (output_size, H)),
        "b_reg": u(ks[5], (output_size,)),
    }


def lstm_reg_reference(x, params):
    """Pure-JAX reference (for verification)."""
    H = HIDDEN_SIZE
    T, B, _ = x.shape
    wih, whh = params["w_ih"], params["w_hh"]
    b = params["b_ih"] + params["b_hh"]

    def step(carry, x_t):
        h, c = carry
        gates = x_t @ wih.T + h @ whh.T + b
        i = jax.nn.sigmoid(gates[:, 0 * H:1 * H])
        f = jax.nn.sigmoid(gates[:, 1 * H:2 * H])
        g = jnp.tanh(gates[:, 2 * H:3 * H])
        o = jax.nn.sigmoid(gates[:, 3 * H:4 * H])
        c = f * c + i * g
        h = o * jnp.tanh(c)
        return (h, c), h

    h0 = jnp.zeros((B, H), jnp.float32)
    c0 = jnp.zeros((B, H), jnp.float32)
    _, hs = jax.lax.scan(step, (h0, c0), x)
    return hs @ params["w_reg"].T + params["b_reg"]


if __name__ == "__main__":
    key = jax.random.PRNGKey(0)
    k_param, k_x = jax.random.split(key)

    T, B = 8, 2                       # small seq / batch
    params = init_params(k_param)
    x = jax.random.normal(k_x, (T, B, INPUT_SIZE), jnp.float32)

    y_ref = jax.block_until_ready(lstm_reg_reference(x, params))

    # Strict-f32 weight path: matches the pure-JAX f32 reference tightly.
    y_f32 = jax.block_until_ready(
        lstm_reg_forward(x, params, recurrent_dtype=jnp.float32))
    assert y_f32.shape == (T, B, OUTPUT_SIZE)
    assert jnp.allclose(y_f32, y_ref, atol=5e-5, rtol=5e-5), "f32 path mismatch"

    # Default (bf16 recurrent weights, f32 accumulation) path: tolerance covers
    # bf16 operand truncation, which is also TPU's default matmul precision.
    y = jax.block_until_ready(lstm_reg_forward(x, params))
    assert y.shape == (T, B, OUTPUT_SIZE)
    assert jnp.allclose(y, y_ref, atol=5e-3, rtol=5e-3), "bf16 path mismatch"

    print("KERNEL_OK")
</pallas_src>

<mosaic_0001>
module attributes {stable_mosaic.version = 11 : i64} {
  func.func @_lstm_block_kernel(%arg0: i32, %arg1: i32, %arg2: memref<8x2x512xf32, #tpu.memory_space<vmem>>, %arg3: memref<128x512xf32, #tpu.memory_space<vmem>>, %arg4: memref<8x2x128xf32, #tpu.memory_space<vmem>>, %arg5: memref<2x128xf32, #tpu.memory_space<vmem>>, %arg6: memref<2x128xf32, #tpu.memory_space<vmem>>) attributes {dimension_semantics = [#tpu.dimension_semantics<parallel>, #tpu.dimension_semantics<arbitrary>], iteration_bounds = array<i64: 1, 1>, scalar_prefetch = 0 : i64, scratch_operands = 2 : i64, tpu.core_type = #tpu.core_type<tc>, window_params = [{transform_indices = @transform_0, window_bounds = array<i64: 8, 2, 512>}, {pipeline_mode = #tpu.pipeline_mode<synchronous>, transform_indices = @transform_1, window_bounds = array<i64: 128, 512>}, {transform_indices = @transform_2, window_bounds = array<i64: 8, 2, 128>}]} {
    %c0_i32 = arith.constant 0 : i32
    %0 = arith.cmpi eq, %arg1, %c0_i32 : i32
    %1 = arith.extui %0 : i1 to i32
    %c0_i32_0 = arith.constant 0 : i32
    %2 = arith.cmpi ne, %1, %c0_i32_0 : i32
    scf.if %2 {
      %cst_136 = arith.constant 0.000000e+00 : f32
      %335 = vector.broadcast %cst_136 : f32 to vector<2x128xf32>
      %c0_137 = arith.constant 0 : index
      %c0_138 = arith.constant 0 : index
      %336 = vector.load %arg5[%c0_137, %c0_138] : memref<2x128xf32, #tpu.memory_space<vmem>>, vector<2x128xf32>
      tpu.vector_store %arg5[%c0_137, %c0_138], %335 {strides = array<i32>} : memref<2x128xf32, #tpu.memory_space<vmem>>, vector<2x128xf32>,
      %cst_139 = arith.constant 0.000000e+00 : f32
      %337 = vector.broadcast %cst_139 : f32 to vector<2x128xf32>
      %c0_140 = arith.constant 0 : index
      %c0_141 = arith.constant 0 : index
      %338 = vector.load %arg6[%c0_140, %c0_141] : memref<2x128xf32, #tpu.memory_space<vmem>>, vector<2x128xf32>
      tpu.vector_store %arg6[%c0_140, %c0_141], %337 {strides = array<i32>} : memref<2x128xf32, #tpu.memory_space<vmem>>, vector<2x128xf32>,
    } else {
    }
    %c0 = arith.constant 0 : index
    %c0_1 = arith.constant 0 : index
    %3 = vector.load %arg5[%c0, %c0_1] : memref<2x128xf32, #tpu.memory_space<vmem>>, vector<2x128xf32>
    %c0_2 = arith.constant 0 : index
    %c0_3 = arith.constant 0 : index
    %4 = vector.load %arg6[%c0_2, %c0_3] : memref<2x128xf32, #tpu.memory_space<vmem>>, vector<2x128xf32>
    %c0_i32_4 = arith.constant 0 : i32
    %5 = arith.index_cast %c0_i32_4 : i32 to index
    %c0_5 = arith.constant 0 : index
    %c0_6 = arith.constant 0 : index
    %6 = vector.load %arg2[%5, %c0_5, %c0_6] : memref<8x2x512xf32, #tpu.memory_space<vmem>>, vector<1x2x512xf32>
    %7 = vector.shape_cast %6 : vector<1x2x512xf32> to vector<2x512xf32>
    %c0_7 = arith.constant 0 : index
    %c0_8 = arith.constant 0 : index
    %8 = vector.load %arg3[%c0_7, %c0_8] : memref<128x512xf32, #tpu.memory_space<vmem>>, vector<128x512xf32>
    %cst = arith.constant dense<0.000000e+00> : vector<2x512xf32>
    %9 = tpu.matmul %3, %8, %cst {dimension_numbers = #tpu.dot_dimension_numbers<[1], [0], [0], [1], [0, 0, 1, 1], [], []>} : vector<2x128xf32>, vector<128x512xf32>, vector<2x512xf32> -> vector<2x512xf32>
    %10 = arith.addf %7, %9 : vector<2x512xf32>
    %11 = vector.extract_strided_slice %10 {offsets = [0, 0], sizes = [2, 128], strides = [1, 1]} : vector<2x512xf32> to vector<2x128xf32>
    %cst_9 = arith.constant 5.000000e-01 : f32
    %12 = vector.broadcast %cst_9 : f32 to vector<2x128xf32>
    %13 = arith.mulf %12, %11 : vector<2x128xf32>
    %14 = math.tanh %13 : vector<2x128xf32>
    %cst_10 = arith.constant 5.000000e-01 : f32
    %15 = vector.broadcast %cst_10 : f32 to vector<2x128xf32>
    %16 = arith.mulf %15, %14 : vector<2x128xf32>
    %cst_11 = arith.constant 5.000000e-01 : f32
    %17 = vector.broadcast %cst_11 : f32 to vector<2x128xf32>
    %18 = arith.addf %16, %17 : vector<2x128xf32>
    %19 = vector.extract_strided_slice %10 {offsets = [0, 128], sizes = [2, 128], strides = [1, 1]} : vector<2x512xf32> to vector<2x128xf32>
    %cst_12 = arith.constant 5.000000e-01 : f32
    %20 = vector.broadcast %cst_12 : f32 to vector<2x128xf32>
    %21 = arith.mulf %20, %19 : vector<2x128xf32>
    %22 = math.tanh %21 : vector<2x128xf32>
    %cst_13 = arith.constant 5.000000e-01 : f32
    %23 = vector.broadcast %cst_13 : f32 to vector<2x128xf32>
    %24 = arith.mulf %23, %22 : vector<2x128xf32>
    %cst_14 = arith.constant 5.000000e-01 : f32
    %25 = vector.broadcast %cst_14 : f32 to vector<2x128xf32>
    %26 = arith.addf %24, %25 : vector<2x128xf32>
    %27 = vector.extract_strided_slice %10 {offsets = [0, 256], sizes = [2, 128], strides = [1, 1]} : vector<2x512xf32> to vector<2x128xf32>
    %28 = math.tanh %27 : vector<2x128xf32>
    %29 = vector.extract_strided_slice %10 {offsets = [0, 384], sizes = [2, 128], strides = [1, 1]} : vector<2x512xf32> to vector<2x128xf32>
    %cst_15 = arith.constant 5.000000e-01 : f32
    %30 = vector.broadcast %cst_15 : f32 to vector<2x128xf32>
    %31 = arith.mulf %30, %29 : vector<2x128xf32>
    %32 = math.tanh %31 : vector<2x128xf32>
    %cst_16 = arith.constant 5.000000e-01 : f32
    %33 = vector.broadcast %cst_16 : f32 to vector<2x128xf32>
    %34 = arith.mulf %33, %32 : vector<2x128xf32>
    %cst_17 = arith.constant 5.000000e-01 : f32
    %35 = vector.broadcast %cst_17 : f32 to vector<2x128xf32>
    %36 = arith.addf %34, %35 : vector<2x128xf32>
    %37 = arith.mulf %26, %4 : vector<2x128xf32>
    %38 = arith.mulf %18, %28 : vector<2x128xf32>
    %39 = arith.addf %37, %38 : vector<2x128xf32>
    %40 = math.tanh %39 : vector<2x128xf32>
    %41 = arith.mulf %36, %40 : vector<2x128xf32>
    %42 = arith.index_cast %c0_i32_4 : i32 to index
    %c0_18 = arith.constant 0 : index
    %c0_19 = arith.constant 0 : index
    %43 = vector.load %arg4[%42, %c0_18, %c0_19] : memref<8x2x128xf32, #tpu.memory_space<vmem>>, vector<1x2x128xf32>
    %44 = vector.shape_cast %43 : vector<1x2x128xf32> to vector<2x128xf32>
    %45 = vector.shape_cast %41 : vector<2x128xf32> to vector<1x2x128xf32>
    tpu.vector_store %arg4[%42, %c0_18, %c0_19], %45 {strides = array<i32>} : memref<8x2x128xf32, #tpu.memory_space<vmem>>, vector<1x2x128xf32>,
    %c1_i32 = arith.constant 1 : i32
    %46 = arith.index_cast %c1_i32 : i32 to index
    %c0_20 = arith.constant 0 : index
    %c0_21 = arith.constant 0 : index
    %47 = vector.load %arg2[%46, %c0_20, %c0_21] : memref<8x2x512xf32, #tpu.memory_space<vmem>>, vector<1x2x512xf32>
    %48 = vector.shape_cast %47 : vector<1x2x512xf32> to vector<2x512xf32>
    %c0_22 = arith.constant 0 : index
    %c0_23 = arith.constant 0 : index
    %49 = vector.load %arg3[%c0_22, %c0_23] : memref<128x512xf32, #tpu.memory_space<vmem>>, vector<128x512xf32>
    %cst_24 = arith.constant dense<0.000000e+00> : vector<2x512xf32>
    %50 = tpu.matmul %41, %49, %cst_24 {dimension_numbers = #tpu.dot_dimension_numbers<[1], [0], [0], [1], [0, 0, 1, 1], [], []>} : vector<2x128xf32>, vector<128x512xf32>, vector<2x512xf32> -> vector<2x512xf32>
    %51 = arith.addf %48, %50 : vector<2x512xf32>
    %52 = vector.extract_strided_slice %51 {offsets = [0, 0], sizes = [2, 128], strides = [1, 1]} : vector<2x512xf32> to vector<2x128xf32>
    %cst_25 = arith.constant 5.000000e-01 : f32
    %53 = vector.broadcast %cst_25 : f32 to vector<2x128xf32>
    %54 = arith.mulf %53, %52 : vector<2x128xf32>
    %55 = math.tanh %54 : vector<2x128xf32>
    %cst_26 = arith.constant 5.000000e-01 : f32
    %56 = vector.broadcast %cst_26 : f32 to vector<2x128xf32>
    %57 = arith.mulf %56, %55 : vector<2x128xf32>
    %cst_27 = arith.constant 5.000000e-01 : f32
    %58 = vector.broadcast %cst_27 : f32 to vector<2x128xf32>
    %59 = arith.addf %57, %58 : vector<2x128xf32>
    %60 = vector.extract_strided_slice %51 {offsets = [0, 128], sizes = [2, 128], strides = [1, 1]} : vector<2x512xf32> to vector<2x128xf32>
    %cst_28 = arith.constant 5.000000e-01 : f32
    %61 = vector.broadcast %cst_28 : f32 to vector<2x128xf32>
    %62 = arith.mulf %61, %60 : vector<2x128xf32>
    %63 = math.tanh %62 : vector<2x128xf32>
    %cst_29 = arith.constant 5.000000e-01 : f32
    %64 = vector.broadcast %cst_29 : f32 to vector<2x128xf32>
    %65 = arith.mulf %64, %63 : vector<2x128xf32>
    %cst_30 = arith.constant 5.000000e-01 : f32
    %66 = vector.broadcast %cst_30 : f32 to vector<2x128xf32>
    %67 = arith.addf %65, %66 : vector<2x128xf32>
    %68 = vector.extract_strided_slice %51 {offsets = [0, 256], sizes = [2, 128], strides = [1, 1]} : vector<2x512xf32> to vector<2x128xf32>
    %69 = math.tanh %68 : vector<2x128xf32>
    %70 = vector.extract_strided_slice %51 {offsets = [0, 384], sizes = [2, 128], strides = [1, 1]} : vector<2x512xf32> to vector<2x128xf32>
    %cst_31 = arith.constant 5.000000e-01 : f32
    %71 = vector.broadcast %cst_31 : f32 to vector<2x128xf32>
    %72 = arith.mulf %71, %70 : vector<2x128xf32>
    %73 = math.tanh %72 : vector<2x128xf32>
    %cst_32 = arith.constant 5.000000e-01 : f32
    %74 = vector.broadcast %cst_32 : f32 to vector<2x128xf32>
    %75 = arith.mulf %74, %73 : vector<2x128xf32>
    %cst_33 = arith.constant 5.000000e-01 : f32
    %76 = vector.broadcast %cst_33 : f32 to vector<2x128xf32>
    %77 = arith.addf %75, %76 : vector<2x128xf32>
    %78 = arith.mulf %67, %39 : vector<2x128xf32>
    %79 = arith.mulf %59, %69 : vector<2x128xf32>
    %80 = arith.addf %78, %79 : vector<2x128xf32>
    %81 = math.tanh %80 : vector<2x128xf32>
    %82 = arith.mulf %77, %81 : vector<2x128xf32>
    %83 = arith.index_cast %c1_i32 : i32 to index
    %c0_34 = arith.constant 0 : index
    %c0_35 = arith.constant 0 : index
    %84 = vector.load %arg4[%83, %c0_34, %c0_35] : memref<8x2x128xf32, #tpu.memory_space<vmem>>, vector<1x2x128xf32>
    %85 = vector.shape_cast %84 : vector<1x2x128xf32> to vector<2x128xf32>
    %86 = vector.shape_cast %82 : vector<2x128xf32> to vector<1x2x128xf32>
    tpu.vector_store %arg4[%83, %c0_34, %c0_35], %86 {strides = array<i32>} : memref<8x2x128xf32, #tpu.memory_space<vmem>>, vector<1x2x128xf32>,
    %c2_i32 = arith.constant 2 : i32
    %87 = arith.index_cast %c2_i32 : i32 to index
    %c0_36 = arith.constant 0 : index
    %c0_37 = arith.constant 0 : index
    %88 = vector.load %arg2[%87, %c0_36, %c0_37] : memref<8x2x512xf32, #tpu.memory_space<vmem>>, vector<1x2x512xf32>
    %89 = vector.shape_cast %88 : vector<1x2x512xf32> to vector<2x512xf32>
    %c0_38 = arith.constant 0 : index
    %c0_39 = arith.constant 0 : index
    %90 = vector.load %arg3[%c0_38, %c0_39] : memref<128x512xf32, #tpu.memory_space<vmem>>, vector<128x512xf32>
    %cst_40 = arith.constant dense<0.000000e+00> : vector<2x512xf32>
    %91 = tpu.matmul %82, %90, %cst_40 {dimension_numbers = #tpu.dot_dimension_numbers<[1], [0], [0], [1], [0, 0, 1, 1], [], []>} : vector<2x128xf32>, vector<128x512xf32>, vector<2x512xf32> -> vector<2x512xf32>
    %92 = arith.addf %89, %91 : vector<2x512xf32>
    %93 = vector.extract_strided_slice %92 {offsets = [0, 0], sizes = [2, 128], strides = [1, 1]} : vector<2x512xf32> to vector<2x128xf32>
    %cst_41 = arith.constant 5.000000e-01 : f32
    %94 = vector.broadcast %cst_41 : f32 to vector<2x128xf32>
    %95 = arith.mulf %94, %93 : vector<2x128xf32>
    %96 = math.tanh %95 : vector<2x128xf32>
    %cst_42 = arith.constant 5.000000e-01 : f32
    %97 = vector.broadcast %cst_42 : f32 to vector<2x128xf32>
    %98 = arith.mulf %97, %96 : vector<2x128xf32>
    %cst_43 = arith.constant 5.000000e-01 : f32
    %99 = vector.broadcast %cst_43 : f32 to vector<2x128xf32>
    %100 = arith.addf %98, %99 : vector<2x128xf32>
    %101 = vector.extract_strided_slice %92 {offsets = [0, 128], sizes = [2, 128], strides = [1, 1]} : vector<2x512xf32> to vector<2x128xf32>
    %cst_44 = arith.constant 5.000000e-01 : f32
    %102 = vector.broadcast %cst_44 : f32 to vector<2x128xf32>
    %103 = arith.mulf %102, %101 : vector<2x128xf32>
    %104 = math.tanh %103 : vector<2x128xf32>
    %cst_45 = arith.constant 5.000000e-01 : f32
    %105 = vector.broadcast %cst_45 : f32 to vector<2x128xf32>
    %106 = arith.mulf %105, %104 : vector<2x128xf32>
    %cst_46 = arith.constant 5.000000e-01 : f32
    %107 = vector.broadcast %cst_46 : f32 to vector<2x128xf32>
    %108 = arith.addf %106, %107 : vector<2x128xf32>
    %109 = vector.extract_strided_slice %92 {offsets = [0, 256], sizes = [2, 128], strides = [1, 1]} : vector<2x512xf32> to vector<2x128xf32>
    %110 = math.tanh %109 : vector<2x128xf32>
    %111 = vector.extract_strided_slice %92 {offsets = [0, 384], sizes = [2, 128], strides = [1, 1]} : vector<2x512xf32> to vector<2x128xf32>
    %cst_47 = arith.constant 5.000000e-01 : f32
    %112 = vector.broadcast %cst_47 : f32 to vector<2x128xf32>
    %113 = arith.mulf %112, %111 : vector<2x128xf32>
    %114 = math.tanh %113 : vector<2x128xf32>
    %cst_48 = arith.constant 5.000000e-01 : f32
    %115 = vector.broadcast %cst_48 : f32 to vector<2x128xf32>
    %116 = arith.mulf %115, %114 : vector<2x128xf32>
    %cst_49 = arith.constant 5.000000e-01 : f32
    %117 = vector.broadcast %cst_49 : f32 to vector<2x128xf32>
    %118 = arith.addf %116, %117 : vector<2x128xf32>
    %119 = arith.mulf %108, %80 : vector<2x128xf32>
    %120 = arith.mulf %100, %110 : vector<2x128xf32>
    %121 = arith.addf %119, %120 : vector<2x128xf32>
    %122 = math.tanh %121 : vector<2x128xf32>
    %123 = arith.mulf %118, %122 : vector<2x128xf32>
    %124 = arith.index_cast %c2_i32 : i32 to index
    %c0_50 = arith.constant 0 : index
    %c0_51 = arith.constant 0 : index
    %125 = vector.load %arg4[%124, %c0_50, %c0_51] : memref<8x2x128xf32, #tpu.memory_space<vmem>>, vector<1x2x128xf32>
    %126 = vector.shape_cast %125 : vector<1x2x128xf32> to vector<2x128xf32>
    %127 = vector.shape_cast %123 : vector<2x128xf32> to vector<1x2x128xf32>
    tpu.vector_store %arg4[%124, %c0_50, %c0_51], %127 {strides = array<i32>} : memref<8x2x128xf32, #tpu.memory_space<vmem>>, vector<1x2x128xf32>,
    %c3_i32 = arith.constant 3 : i32
    %128 = arith.index_cast %c3_i32 : i32 to index
    %c0_52 = arith.constant 0 : index
    %c0_53 = arith.constant 0 : index
    %129 = vector.load %arg2[%128, %c0_52, %c0_53] : memref<8x2x512xf32, #tpu.memory_space<vmem>>, vector<1x2x512xf32>
    %130 = vector.shape_cast %129 : vector<1x2x512xf32> to vector<2x512xf32>
    %c0_54 = arith.constant 0 : index
    %c0_55 = arith.constant 0 : index
    %131 = vector.load %arg3[%c0_54, %c0_55] : memref<128x512xf32, #tpu.memory_space<vmem>>, vector<128x512xf32>
    %cst_56 = arith.constant dense<0.000000e+00> : vector<2x512xf32>
    %132 = tpu.matmul %123, %131, %cst_56 {dimension_numbers = #tpu.dot_dimension_numbers<[1], [0], [0], [1], [0, 0, 1, 1], [], []>} : vector<2x128xf32>, vector<128x512xf32>, vector<2x512xf32> -> vector<2x512xf32>
    %133 = arith.addf %130, %132 : vector<2x512xf32>
    %134 = vector.extract_strided_slice %133 {offsets = [0, 0], sizes = [2, 128], strides = [1, 1]} : vector<2x512xf32> to vector<2x128xf32>
    %cst_57 = arith.constant 5.000000e-01 : f32
    %135 = vector.broadcast %cst_57 : f32 to vector<2x128xf32>
    %136 = arith.mulf %135, %134 : vector<2x128xf32>
    %137 = math.tanh %136 : vector<2x128xf32>
    %cst_58 = arith.constant 5.000000e-01 : f32
    %138 = vector.broadcast %cst_58 : f32 to vector<2x128xf32>
    %139 = arith.mulf %138, %137 : vector<2x128xf32>
    %cst_59 = arith.constant 5.000000e-01 : f32
    %140 = vector.broadcast %cst_59 : f32 to vector<2x128xf32>
    %141 = arith.addf %139, %140 : vector<2x128xf32>
    %142 = vector.extract_strided_slice %133 {offsets = [0, 128], sizes = [2, 128], strides = [1, 1]} : vector<2x512xf32> to vector<2x128xf32>
    %cst_60 = arith.constant 5.000000e-01 : f32
    %143 = vector.broadcast %cst_60 : f32 to vector<2x128xf32>
    %144 = arith.mulf %143, %142 : vector<2x128xf32>
    %145 = math.tanh %144 : vector<2x128xf32>
    %cst_61 = arith.constant 5.000000e-01 : f32
    %146 = vector.broadcast %cst_61 : f32 to vector<2x128xf32>
    %147 = arith.mulf %146, %145 : vector<2x128xf32>
    %cst_62 = arith.constant 5.000000e-01 : f32
    %148 = vector.broadcast %cst_62 : f32 to vector<2x128xf32>
    %149 = arith.addf %147, %148 : vector<2x128xf32>
    %150 = vector.extract_strided_slice %133 {offsets = [0, 256], sizes = [2, 128], strides = [1, 1]} : vector<2x512xf32> to vector<2x128xf32>
    %151 = math.tanh %150 : vector<2x128xf32>
    %152 = vector.extract_strided_slice %133 {offsets = [0, 384], sizes = [2, 128], strides = [1, 1]} : vector<2x512xf32> to vector<2x128xf32>
    %cst_63 = arith.constant 5.000000e-01 : f32
    %153 = vector.broadcast %cst_63 : f32 to vector<2x128xf32>
    %154 = arith.mulf %153, %152 : vector<2x128xf32>
    %155 = math.tanh %154 : vector<2x128xf32>
    %cst_64 = arith.constant 5.000000e-01 : f32
    %156 = vector.broadcast %cst_64 : f32 to vector<2x128xf32>
    %157 = arith.mulf %156, %155 : vector<2x128xf32>
    %cst_65 = arith.constant 5.000000e-01 : f32
    %158 = vector.broadcast %cst_65 : f32 to vector<2x128xf32>
    %159 = arith.addf %157, %158 : vector<2x128xf32>
    %160 = arith.mulf %149, %121 : vector<2x128xf32>
    %161 = arith.mulf %141, %151 : vector<2x128xf32>
    %162 = arith.addf %160, %161 : vector<2x128xf32>
    %163 = math.tanh %162 : vector<2x128xf32>
    %164 = arith.mulf %159, %163 : vector<2x128xf32>
    %165 = arith.index_cast %c3_i32 : i32 to index
    %c0_66 = arith.constant 0 : index
    %c0_67 = arith.constant 0 : index
    %166 = vector.load %arg4[%165, %c0_66, %c0_67] : memref<8x2x128xf32, #tpu.memory_space<vmem>>, vector<1x2x128xf32>
    %167 = vector.shape_cast %166 : vector<1x2x128xf32> to vector<2x128xf32>
    %168 = vector.shape_cast %164 : vector<2x128xf32> to vector<1x2x128xf32>
    tpu.vector_store %arg4[%165, %c0_66, %c0_67], %168 {strides = array<i32>} : memref<8x2x128xf32, #tpu.memory_space<vmem>>, vector<1x2x128xf32>,
    %c4_i32 = arith.constant 4 : i32
    %169 = arith.index_cast %c4_i32 : i32 to index
    %c0_68 = arith.constant 0 : index
    %c0_69 = arith.constant 0 : index
    %170 = vector.load %arg2[%169, %c0_68, %c0_69] : memref<8x2x512xf32, #tpu.memory_space<vmem>>, vector<1x2x512xf32>
    %171 = vector.shape_cast %170 : vector<1x2x512xf32> to vector<2x512xf32>
    %c0_70 = arith.constant 0 : index
    %c0_71 = arith.constant 0 : index
    %172 = vector.load %arg3[%c0_70, %c0_71] : memref<128x512xf32, #tpu.memory_space<vmem>>, vector<128x512xf32>
    %cst_72 = arith.constant dense<0.000000e+00> : vector<2x512xf32>
    %173 = tpu.matmul %164, %172, %cst_72 {dimension_numbers = #tpu.dot_dimension_numbers<[1], [0], [0], [1], [0, 0, 1, 1], [], []>} : vector<2x128xf32>, vector<128x512xf32>, vector<2x512xf32> -> vector<2x512xf32>
    %174 = arith.addf %171, %173 : vector<2x512xf32>
    %175 = vector.extract_strided_slice %174 {offsets = [0, 0], sizes = [2, 128], strides = [1, 1]} : vector<2x512xf32> to vector<2x128xf32>
    %cst_73 = arith.constant 5.000000e-01 : f32
    %176 = vector.broadcast %cst_73 : f32 to vector<2x128xf32>
    %177 = arith.mulf %176, %175 : vector<2x128xf32>
    %178 = math.tanh %177 : vector<2x128xf32>
    %cst_74 = arith.constant 5.000000e-01 : f32
    %179 = vector.broadcast %cst_74 : f32 to vector<2x128xf32>
    %180 = arith.mulf %179, %178 : vector<2x128xf32>
    %cst_75 = arith.constant 5.000000e-01 : f32
    %181 = vector.broadcast %cst_75 : f32 to vector<2x128xf32>
    %182 = arith.addf %180, %181 : vector<2x128xf32>
    %183 = vector.extract_strided_slice %174 {offsets = [0, 128], sizes = [2, 128], strides = [1, 1]} : vector<2x512xf32> to vector<2x128xf32>
    %cst_76 = arith.constant 5.000000e-01 : f32
    %184 = vector.broadcast %cst_76 : f32 to vector<2x128xf32>
    %185 = arith.mulf %184, %183 : vector<2x128xf32>
    %186 = math.tanh %185 : vector<2x128xf32>
    %cst_77 = arith.constant 5.000000e-01 : f32
    %187 = vector.broadcast %cst_77 : f32 to vector<2x128xf32>
    %188 = arith.mulf %187, %186 : vector<2x128xf32>
    %cst_78 = arith.constant 5.000000e-01 : f32
    %189 = vector.broadcast %cst_78 : f32 to vector<2x128xf32>
    %190 = arith.addf %188, %189 : vector<2x128xf32>
    %191 = vector.extract_strided_slice %174 {offsets = [0, 256], sizes = [2, 128], strides = [1, 1]} : vector<2x512xf32> to vector<2x128xf32>
    %192 = math.tanh %191 : vector<2x128xf32>
    %193 = vector.extract_strided_slice %174 {offsets = [0, 384], sizes = [2, 128], strides = [1, 1]} : vector<2x512xf32> to vector<2x128xf32>
    %cst_79 = arith.constant 5.000000e-01 : f32
    %194 = vector.broadcast %cst_79 : f32 to vector<2x128xf32>
    %195 = arith.mulf %194, %193 : vector<2x128xf32>
    %196 = math.tanh %195 : vector<2x128xf32>
    %cst_80 = arith.constant 5.000000e-01 : f32
    %197 = vector.broadcast %cst_80 : f32 to vector<2x128xf32>
    %198 = arith.mulf %197, %196 : vector<2x128xf32>
    %cst_81 = arith.constant 5.000000e-01 : f32
    %199 = vector.broadcast %cst_81 : f32 to vector<2x128xf32>
    %200 = arith.addf %198, %199 : vector<2x128xf32>
    %201 = arith.mulf %190, %162 : vector<2x128xf32>
    %202 = arith.mulf %182, %192 : vector<2x128xf32>
    %203 = arith.addf %201, %202 : vector<2x128xf32>
    %204 = math.tanh %203 : vector<2x128xf32>
    %205 = arith.mulf %200, %204 : vector<2x128xf32>
    %206 = arith.index_cast %c4_i32 : i32 to index
    %c0_82 = arith.constant 0 : index
    %c0_83 = arith.constant 0 : index
    %207 = vector.load %arg4[%206, %c0_82, %c0_83] : memref<8x2x128xf32, #tpu.memory_space<vmem>>, vector<1x2x128xf32>
    %208 = vector.shape_cast %207 : vector<1x2x128xf32> to vector<2x128xf32>
    %209 = vector.shape_cast %205 : vector<2x128xf32> to vector<1x2x128xf32>
    tpu.vector_store %arg4[%206, %c0_82, %c0_83], %209 {strides = array<i32>} : memref<8x2x128xf32, #tpu.memory_space<vmem>>, vector<1x2x128xf32>,
    %c5_i32 = arith.constant 5 : i32
    %210 = arith.index_cast %c5_i32 : i32 to index
    %c0_84 = arith.constant 0 : index
    %c0_85 = arith.constant 0 : index
    %211 = vector.load %arg2[%210, %c0_84, %c0_85] : memref<8x2x512xf32, #tpu.memory_space<vmem>>, vector<1x2x512xf32>
    %212 = vector.shape_cast %211 : vector<1x2x512xf32> to vector<2x512xf32>
    %c0_86 = arith.constant 0 : index
    %c0_87 = arith.constant 0 : index
    %213 = vector.load %arg3[%c0_86, %c0_87] : memref<128x512xf32, #tpu.memory_space<vmem>>, vector<128x512xf32>
    %cst_88 = arith.constant dense<0.000000e+00> : vector<2x512xf32>
    %214 = tpu.matmul %205, %213, %cst_88 {dimension_numbers = #tpu.dot_dimension_numbers<[1], [0], [0], [1], [0, 0, 1, 1], [], []>} : vector<2x128xf32>, vector<128x512xf32>, vector<2x512xf32> -> vector<2x512xf32>
    %215 = arith.addf %212, %214 : vector<2x512xf32>
    %216 = vector.extract_strided_slice %215 {offsets = [0, 0], sizes = [2, 128], strides = [1, 1]} : vector<2x512xf32> to vector<2x128xf32>
    %cst_89 = arith.constant 5.000000e-01 : f32
    %217 = vector.broadcast %cst_89 : f32 to vector<2x128xf32>
    %218 = arith.mulf %217, %216 : vector<2x128xf32>
    %219 = math.tanh %218 : vector<2x128xf32>
    %cst_90 = arith.constant 5.000000e-01 : f32
    %220 = vector.broadcast %cst_90 : f32 to vector<2x128xf32>
    %221 = arith.mulf %220, %219 : vector<2x128xf32>
    %cst_91 = arith.constant 5.000000e-01 : f32
    %222 = vector.broadcast %cst_91 : f32 to vector<2x128xf32>
    %223 = arith.addf %221, %222 : vector<2x128xf32>
    %224 = vector.extract_strided_slice %215 {offsets = [0, 128], sizes = [2, 128], strides = [1, 1]} : vector<2x512xf32> to vector<2x128xf32>
    %cst_92 = arith.constant 5.000000e-01 : f32
    %225 = vector.broadcast %cst_92 : f32 to vector<2x128xf32>
    %226 = arith.mulf %225, %224 : vector<2x128xf32>
    %227 = math.tanh %226 : vector<2x128xf32>
    %cst_93 = arith.constant 5.000000e-01 : f32
    %228 = vector.broadcast %cst_93 : f32 to vector<2x128xf32>
    %229 = arith.mulf %228, %227 : vector<2x128xf32>
    %cst_94 = arith.constant 5.000000e-01 : f32
    %230 = vector.broadcast %cst_94 : f32 to vector<2x128xf32>
    %231 = arith.addf %229, %230 : vector<2x128xf32>
    %232 = vector.extract_strided_slice %215 {offsets = [0, 256], sizes = [2, 128], strides = [1, 1]} : vector<2x512xf32> to vector<2x128xf32>
    %233 = math.tanh %232 : vector<2x128xf32>
    %234 = vector.extract_strided_slice %215 {offsets = [0, 384], sizes = [2, 128], strides = [1, 1]} : vector<2x512xf32> to vector<2x128xf32>
    %cst_95 = arith.constant 5.000000e-01 : f32
    %235 = vector.broadcast %cst_95 : f32 to vector<2x128xf32>
    %236 = arith.mulf %235, %234 : vector<2x128xf32>
    %237 = math.tanh %236 : vector<2x128xf32>
    %cst_96 = arith.constant 5.000000e-01 : f32
    %238 = vector.broadcast %cst_96 : f32 to vector<2x128xf32>
    %239 = arith.mulf %238, %237 : vector<2x128xf32>
    %cst_97 = arith.constant 5.000000e-01 : f32
    %240 = vector.broadcast %cst_97 : f32 to vector<2x128xf32>
    %241 = arith.addf %239, %240 : vector<2x128xf32>
    %242 = arith.mulf %231, %203 : vector<2x128xf32>
    %243 = arith.mulf %223, %233 : vector<2x128xf32>
    %244 = arith.addf %242, %243 : vector<2x128xf32>
    %245 = math.tanh %244 : vector<2x128xf32>
    %246 = arith.mulf %241, %245 : vector<2x128xf32>
    %247 = arith.index_cast %c5_i32 : i32 to index
    %c0_98 = arith.constant 0 : index
    %c0_99 = arith.constant 0 : index
    %248 = vector.load %arg4[%247, %c0_98, %c0_99] : memref<8x2x128xf32, #tpu.memory_space<vmem>>, vector<1x2x128xf32>
    %249 = vector.shape_cast %248 : vector<1x2x128xf32> to vector<2x128xf32>
    %250 = vector.shape_cast %246 : vector<2x128xf32> to vector<1x2x128xf32>
    tpu.vector_store %arg4[%247, %c0_98, %c0_99], %250 {strides = array<i32>} : memref<8x2x128xf32, #tpu.memory_space<vmem>>, vector<1x2x128xf32>,
    %c6_i32 = arith.constant 6 : i32
    %251 = arith.index_cast %c6_i32 : i32 to index
    %c0_100 = arith.constant 0 : index
    %c0_101 = arith.constant 0 : index
    %252 = vector.load %arg2[%251, %c0_100, %c0_101] : memref<8x2x512xf32, #tpu.memory_space<vmem>>, vector<1x2x512xf32>
    %253 = vector.shape_cast %252 : vector<1x2x512xf32> to vector<2x512xf32>
    %c0_102 = arith.constant 0 : index
    %c0_103 = arith.constant 0 : index
    %254 = vector.load %arg3[%c0_102, %c0_103] : memref<128x512xf32, #tpu.memory_space<vmem>>, vector<128x512xf32>
    %cst_104 = arith.constant dense<0.000000e+00> : vector<2x512xf32>
    %255 = tpu.matmul %246, %254, %cst_104 {dimension_numbers = #tpu.dot_dimension_numbers<[1], [0], [0], [1], [0, 0, 1, 1], [], []>} : vector<2x128xf32>, vector<128x512xf32>, vector<2x512xf32> -> vector<2x512xf32>
    %256 = arith.addf %253, %255 : vector<2x512xf32>
    %257 = vector.extract_strided_slice %256 {offsets = [0, 0], sizes = [2, 128], strides = [1, 1]} : vector<2x512xf32> to vector<2x128xf32>
    %cst_105 = arith.constant 5.000000e-01 : f32
    %258 = vector.broadcast %cst_105 : f32 to vector<2x128xf32>
    %259 = arith.mulf %258, %257 : vector<2x128xf32>
    %260 = math.tanh %259 : vector<2x128xf32>
    %cst_106 = arith.constant 5.000000e-01 : f32
    %261 = vector.broadcast %cst_106 : f32 to vector<2x128xf32>
    %262 = arith.mulf %261, %260 : vector<2x128xf32>
    %cst_107 = arith.constant 5.000000e-01 : f32
    %263 = vector.broadcast %cst_107 : f32 to vector<2x128xf32>
    %264 = arith.addf %262, %263 : vector<2x128xf32>
    %265 = vector.extract_strided_slice %256 {offsets = [0, 128], sizes = [2, 128], strides = [1, 1]} : vector<2x512xf32> to vector<2x128xf32>
    %cst_108 = arith.constant 5.000000e-01 : f32
    %266 = vector.broadcast %cst_108 : f32 to vector<2x128xf32>
    %267 = arith.mulf %266, %265 : vector<2x128xf32>
    %268 = math.tanh %267 : vector<2x128xf32>
    %cst_109 = arith.constant 5.000000e-01 : f32
    %269 = vector.broadcast %cst_109 : f32 to vector<2x128xf32>
    %270 = arith.mulf %269, %268 : vector<2x128xf32>
    %cst_110 = arith.constant 5.000000e-01 : f32
    %271 = vector.broadcast %cst_110 : f32 to vector<2x128xf32>
    %272 = arith.addf %270, %271 : vector<2x128xf32>
    %273 = vector.extract_strided_slice %256 {offsets = [0, 256], sizes = [2, 128], strides = [1, 1]} : vector<2x512xf32> to vector<2x128xf32>
    %274 = math.tanh %273 : vector<2x128xf32>
    %275 = vector.extract_strided_slice %256 {offsets = [0, 384], sizes = [2, 128], strides = [1, 1]} : vector<2x512xf32> to vector<2x128xf32>
    %cst_111 = arith.constant 5.000000e-01 : f32
    %276 = vector.broadcast %cst_111 : f32 to vector<2x128xf32>
    %277 = arith.mulf %276, %275 : vector<2x128xf32>
    %278 = math.tanh %277 : vector<2x128xf32>
    %cst_112 = arith.constant 5.000000e-01 : f32
    %279 = vector.broadcast %cst_112 : f32 to vector<2x128xf32>
    %280 = arith.mulf %279, %278 : vector<2x128xf32>
    %cst_113 = arith.constant 5.000000e-01 : f32
    %281 = vector.broadcast %cst_113 : f32 to vector<2x128xf32>
    %282 = arith.addf %280, %281 : vector<2x128xf32>
    %283 = arith.mulf %272, %244 : vector<2x128xf32>
    %284 = arith.mulf %264, %274 : vector<2x128xf32>
    %285 = arith.addf %283, %284 : vector<2x128xf32>
    %286 = math.tanh %285 : vector<2x128xf32>
    %287 = arith.mulf %282, %286 : vector<2x128xf32>
    %288 = arith.index_cast %c6_i32 : i32 to index
    %c0_114 = arith.constant 0 : index
    %c0_115 = arith.constant 0 : index
    %289 = vector.load %arg4[%288, %c0_114, %c0_115] : memref<8x2x128xf32, #tpu.memory_space<vmem>>, vector<1x2x128xf32>
    %290 = vector.shape_cast %289 : vector<1x2x128xf32> to vector<2x128xf32>
    %291 = vector.shape_cast %287 : vector<2x128xf32> to vector<1x2x128xf32>
    tpu.vector_store %arg4[%288, %c0_114, %c0_115], %291 {strides = array<i32>} : memref<8x2x128xf32, #tpu.memory_space<vmem>>, vector<1x2x128xf32>,
    %c7_i32 = arith.constant 7 : i32
    %292 = arith.index_cast %c7_i32 : i32 to index
    %c0_116 = arith.constant 0 : index
    %c0_117 = arith.constant 0 : index
    %293 = vector.load %arg2[%292, %c0_116, %c0_117] : memref<8x2x512xf32, #tpu.memory_space<vmem>>, vector<1x2x512xf32>
    %294 = vector.shape_cast %293 : vector<1x2x512xf32> to vector<2x512xf32>
    %c0_118 = arith.constant 0 : index
    %c0_119 = arith.constant 0 : index
    %295 = vector.load %arg3[%c0_118, %c0_119] : memref<128x512xf32, #tpu.memory_space<vmem>>, vector<128x512xf32>
    %cst_120 = arith.constant dense<0.000000e+00> : vector<2x512xf32>
    %296 = tpu.matmul %287, %295, %cst_120 {dimension_numbers = #tpu.dot_dimension_numbers<[1], [0], [0], [1], [0, 0, 1, 1], [], []>} : vector<2x128xf32>, vector<128x512xf32>, vector<2x512xf32> -> vector<2x512xf32>
    %297 = arith.addf %294, %296 : vector<2x512xf32>
    %298 = vector.extract_strided_slice %297 {offsets = [0, 0], sizes = [2, 128], strides = [1, 1]} : vector<2x512xf32> to vector<2x128xf32>
    %cst_121 = arith.constant 5.000000e-01 : f32
    %299 = vector.broadcast %cst_121 : f32 to vector<2x128xf32>
    %300 = arith.mulf %299, %298 : vector<2x128xf32>
    %301 = math.tanh %300 : vector<2x128xf32>
    %cst_122 = arith.constant 5.000000e-01 : f32
    %302 = vector.broadcast %cst_122 : f32 to vector<2x128xf32>
    %303 = arith.mulf %302, %301 : vector<2x128xf32>
    %cst_123 = arith.constant 5.000000e-01 : f32
    %304 = vector.broadcast %cst_123 : f32 to vector<2x128xf32>
    %305 = arith.addf %303, %304 : vector<2x128xf32>
    %306 = vector.extract_strided_slice %297 {offsets = [0, 128], sizes = [2, 128], strides = [1, 1]} : vector<2x512xf32> to vector<2x128xf32>
    %cst_124 = arith.constant 5.000000e-01 : f32
    %307 = vector.broadcast %cst_124 : f32 to vector<2x128xf32>
    %308 = arith.mulf %307, %306 : vector<2x128xf32>
    %309 = math.tanh %308 : vector<2x128xf32>
    %cst_125 = arith.constant 5.000000e-01 : f32
    %310 = vector.broadcast %cst_125 : f32 to vector<2x128xf32>
    %311 = arith.mulf %310, %309 : vector<2x128xf32>
    %cst_126 = arith.constant 5.000000e-01 : f32
    %312 = vector.broadcast %cst_126 : f32 to vector<2x128xf32>
    %313 = arith.addf %311, %312 : vector<2x128xf32>
    %314 = vector.extract_strided_slice %297 {offsets = [0, 256], sizes = [2, 128], strides = [1, 1]} : vector<2x512xf32> to vector<2x128xf32>
    %315 = math.tanh %314 : vector<2x128xf32>
    %316 = vector.extract_strided_slice %297 {offsets = [0, 384], sizes = [2, 128], strides = [1, 1]} : vector<2x512xf32> to vector<2x128xf32>
    %cst_127 = arith.constant 5.000000e-01 : f32
    %317 = vector.broadcast %cst_127 : f32 to vector<2x128xf32>
    %318 = arith.mulf %317, %316 : vector<2x128xf32>
    %319 = math.tanh %318 : vector<2x128xf32>
    %cst_128 = arith.constant 5.000000e-01 : f32
    %320 = vector.broadcast %cst_128 : f32 to vector<2x128xf32>
    %321 = arith.mulf %320, %319 : vector<2x128xf32>
    %cst_129 = arith.constant 5.000000e-01 : f32
    %322 = vector.broadcast %cst_129 : f32 to vector<2x128xf32>
    %323 = arith.addf %321, %322 : vector<2x128xf32>
    %324 = arith.mulf %313, %285 : vector<2x128xf32>
    %325 = arith.mulf %305, %315 : vector<2x128xf32>
    %326 = arith.addf %324, %325 : vector<2x128xf32>
    %327 = math.tanh %326 : vector<2x128xf32>
    %328 = arith.mulf %323, %327 : vector<2x128xf32>
    %329 = arith.index_cast %c7_i32 : i32 to index
    %c0_130 = arith.constant 0 : index
    %c0_131 = arith.constant 0 : index
    %330 = vector.load %arg4[%329, %c0_130, %c0_131] : memref<8x2x128xf32, #tpu.memory_space<vmem>>, vector<1x2x128xf32>
    %331 = vector.shape_cast %330 : vector<1x2x128xf32> to vector<2x128xf32>
    %332 = vector.shape_cast %328 : vector<2x128xf32> to vector<1x2x128xf32>
    tpu.vector_store %arg4[%329, %c0_130, %c0_131], %332 {strides = array<i32>} : memref<8x2x128xf32, #tpu.memory_space<vmem>>, vector<1x2x128xf32>,
    %c8_i32 = arith.constant 8 : i32
    %c0_132 = arith.constant 0 : index
    %c0_133 = arith.constant 0 : index
    %333 = vector.load %arg5[%c0_132, %c0_133] : memref<2x128xf32, #tpu.memory_space<vmem>>, vector<2x128xf32>
    tpu.vector_store %arg5[%c0_132, %c0_133], %328 {strides = array<i32>} : memref<2x128xf32, #tpu.memory_space<vmem>>, vector<2x128xf32>,
    %c0_134 = arith.constant 0 : index
    %c0_135 = arith.constant 0 : index
    %334 = vector.load %arg6[%c0_134, %c0_135] : memref<2x128xf32, #tpu.memory_space<vmem>>, vector<2x128xf32>
    tpu.vector_store %arg6[%c0_134, %c0_135], %326 {strides = array<i32>} : memref<2x128xf32, #tpu.memory_space<vmem>>, vector<2x128xf32>,
    return
  }
  func.func @transform_0(%arg0: i32, %arg1: i32) -> (i32, i32, i32) {
    %c0_i32 = arith.constant 0 : i32
    %c0_i32_0 = arith.constant 0 : i32
    return %arg1, %arg0, %c0_i32 : i32, i32, i32
  }
  func.func @transform_1(%arg0: i32, %arg1: i32) -> (i32, i32) {
    %c0_i32 = arith.constant 0 : i32
    %c0_i32_0 = arith.constant 0 : i32
    %c0_i32_1 = arith.constant 0 : i32
    return %c0_i32, %c0_i32_0 : i32, i32
  }
  func.func @transform_2(%arg0: i32, %arg1: i32) -> (i32, i32, i32) {
    %c0_i32 = arith.constant 0 : i32
    %c0_i32_0 = arith.constant 0 : i32
    return %arg1, %arg0, %c0_i32 : i32, i32, i32
  }
}

</mosaic_0001>

<bundles_post_ra>
// kernel: tpu_custom_call.1
= control target key start
LH: loop header
LB: loop body
LE: loop exit
PB: predicated region body
PF: predicated region fallthrough
CT: control target
= control target key end

     0   :  { %7 = vsyncpa [#allocation5], 0  ;;  %s2566_s0 = inlined_call_operand.hbm [shape: f32[8,2,512], index: 0, kind: input, shape index: {}]   ;;  %s2567_s1 = inlined_call_operand.hbm [shape: f32[128,512], index: 1, kind: input, shape index: {}]   ;;  %s2568_s2 = inlined_call_operand.hbm [shape: f32[8,2,128], index: 2, kind: output, shape index: {}]  }
   0x1   :  { %8 = vsyncpa [#allocation8], 0 }
   0x2   :  { %9 = vsyncpa [#allocation6], 0  ;;  %s14_s11 = sshll.u32 %s2566_s0, 4  ;;  %s1722_s12 = smov [#allocation4]   ;;  %s15_s11 = int_to_ptr.hbm [resolvable:$true] %s14_s11 }
   0x3   :  { %s16_s13 = sshll.u32 %s1722_s12, 4  ;;  %s27_s16 = sshll.u32 %s2567_s1, 4  ;;  %s17_s13 = int_to_ptr.vmem [resolvable:$true] %s16_s13  ;;  %s28_s16 = int_to_ptr.hbm [resolvable:$true] %s27_s16 }
   0x4   :  { %s1723_s17 = smov 128   ;;  %s1724_s18 = smov 8  }
   0x5   :  { %22 = dma.hbm_to_vmem [thread:$0]  %s15_s11, 1024, %s17_s13, [#allocation5], %s1723_s17, %s1723_s17, %s1724_s18  }
   0x6   :  { %s1725_s19 = smov [#allocation7]   ;;  %s1726_s21 = smov 512  }
   0x7   :  { %s29_s20 = sshll.u32 %s1725_s19, 4  ;;  %s1727_s22 = smov 32   ;;  %s30_s20 = int_to_ptr.vmem [resolvable:$true] %s29_s20 }
   0x8   :  { %35 = dma.hbm_to_vmem [thread:$0]  %s28_s16, 8192, %s30_s20, [#allocation8], %s1726_s21, %s1726_s21, %s1727_s22  }
   0x9   :  { %1716 = dma.done.wait [#allocation5], 1024  }
   0xa   :  { %1717 = vsyncadd [#allocation5], 4294966272 }
   0xb   :  { %1718 = dma.done.wait [#allocation8], 8192  }
   0xc   :  { %1719 = vsyncadd [#allocation8], 4294959104  ;;  %v1728_v0 = vmov 0.0   ;;  %v1753_v1 = vld [vmem:[#allocation7 + $0x1f0] sm:$0xff]  ;;  %v1755_v2 = vld [vmem:[#allocation7 + $0x1f8] sm:$0xff]  ;;  %vm204_vm0 = vcmask 1041408  }
   0xd   :  { %48 = vst [vmem:[#allocation2] sm:$0x3] %v1728_v0  ;;  %v1757_v3 = vld [vmem:[#allocation7 + $0x1d0] sm:$0xff]  ;;  %157 = vmatpush.msra.mxu2 %v1753_v1  ;;  %177 = vmatpush.msra.mxu3 %v1755_v2  ;;  %v1761_v4 = vld [vmem:[#allocation7 + $0x1d8] sm:$0xff]  ;;  %v1767_v7 = vld [vmem:[#allocation7 + $0x1e8] sm:$0xff]  ;;  %vm206_vm1 = vcmask 1045508  }
   0xe   :  { %49 = vst [vmem:[#allocation3] sm:$0x3] %v1728_v0  ;;  %v1763_v5 = vld [vmem:[#allocation7 + $0x1b0] sm:$0xff]  ;;  %v1765_v6 = vld [vmem:[#allocation7 + $0x1b8] sm:$0xff]  ;;  %v1771_v8 = vld [vmem:[#allocation7 + $0x1e0] sm:$0xff]  ;;  %137 = vmatpush.msra.mxu1 %v1767_v7  ;;  %vm208_vm2 = vcmask 1043456  }
   0xf   :  { %158 = vmatpush.msra.mxu2 %v1757_v3  ;;  %178 = vmatpush.msra.mxu3 %v1761_v4  ;;  %v1773_v9 = vld [vmem:[#allocation7 + $0x1c8] sm:$0xff]  ;;  %v1776_v10 = vld [vmem:[#allocation7 + $0x190] sm:$0xff]  ;;  %v1778_v11 = vld [vmem:[#allocation7 + $0x198] sm:$0xff]  ;;  %s1729_s0 = smov [#allocation9]   ;;  %s1541_s25 = sshll.u32 %s2568_s2, 4  ;;  %s1542_s25 = int_to_ptr.hbm [resolvable:$true] %s1541_s25 }
  0x10   :  { %117 = vmatpush.msra.mxu0 %v1771_v8  ;;  %v1781_v12 = vld [vmem:[#allocation7 + $0x1c0] sm:$0xff]  ;;  %v1785_v13 = vld [vmem:[#allocation7 + $0x1a8] sm:$0xff]  ;;  %138 = vmatpush.msra.mxu1 %v1773_v9  ;;  %v1790_v15 = vld [vmem:[#allocation7 + $0x170] sm:$0xff]  ;;  %s1539_s1 = sshll.u32 %s1729_s0, 4  ;;  %s1730_s26 = smov 2   ;;  %s1540_s1 = int_to_ptr.vmem [resolvable:$true] %s1539_s1 }
  0x11   :  { %159 = vmatpush.msra.mxu2 %v1763_v5  ;;  %179 = vmatpush.msra.mxu3 %v1765_v6  ;;  %v1787_v14 = vld [vmem:[#allocation7 + $0x1a0] sm:$0xff]  ;;  %v1792_v16 = vld [vmem:[#allocation7 + $0x178] sm:$0xff]  ;;  %v1797_v17 = vld [vmem:[#allocation7 + $0x188] sm:$0xff] }
  0x12   :  { %118 = vmatpush.msra.mxu0 %v1781_v12  ;;  %v1799_v18 = vld [vmem:[#allocation7 + $0x180] sm:$0xff]  ;;  %139 = vmatpush.msra.mxu1 %v1785_v13  ;;  %v1802_v19 = vld [vmem:[#allocation7 + $0x150] sm:$0xff]  ;;  %v1804_v20 = vld [vmem:[#allocation7 + $0x158] sm:$0xff] }
  0x13   :  { %160 = vmatpush.msra.mxu2 %v1776_v10  ;;  %180 = vmatpush.msra.mxu3 %v1778_v11  ;;  %v1809_v21 = vld [vmem:[#allocation7 + $0x168] sm:$0xff]  ;;  %v1811_v22 = vld [vmem:[#allocation7 + $0x160] sm:$0xff]  ;;  %v1814_v23 = vld [vmem:[#allocation7 + $0x130] sm:$0xff] }
  0x14   :  { %119 = vmatpush.msra.mxu0 %v1787_v14  ;;  %140 = vmatpush.msra.mxu1 %v1797_v17  ;;  %v1816_v24 = vld [vmem:[#allocation7 + $0x138] sm:$0xff]  ;;  %v1821_v25 = vld [vmem:[#allocation7 + $0x148] sm:$0xff]  ;;  %v1823_v26 = vld [vmem:[#allocation7 + $0x140] sm:$0xff] }
  0x15   :  { %161 = vmatpush.msra.mxu2 %v1790_v15  ;;  %181 = vmatpush.msra.mxu3 %v1792_v16  ;;  %v1826_v27 = vld [vmem:[#allocation7 + $0x110] sm:$0xff]  ;;  %v1828_v28 = vld [vmem:[#allocation7 + $0x118] sm:$0xff]  ;;  %v1833_v29 = vld [vmem:[#allocation7 + $0x128] sm:$0xff] }
  0x16   :  { %120 = vmatpush.msra.mxu0 %v1799_v18  ;;  %141 = vmatpush.msra.mxu1 %v1809_v21  ;;  %v1835_v30 = vld [vmem:[#allocation7 + $0x120] sm:$0xff]  ;;  %v1838_v31 = vld [vmem:[#allocation7 + $0xf0] sm:$0xff]  ;;  %v1840_v32 = vld [vmem:[#allocation7 + $0xf8] sm:$0xff] }
  0x17   :  { %162 = vmatpush.msra.mxu2 %v1802_v19  ;;  %182 = vmatpush.msra.mxu3 %v1804_v20  ;;  %v1845_v33 = vld [vmem:[#allocation7 + $0x108] sm:$0xff]  ;;  %v1847_v34 = vld [vmem:[#allocation7 + $0x100] sm:$0xff]  ;;  %v1850_v35 = vld [vmem:[#allocation7 + $0xd0] sm:$0xff] }
  0x18   :  { %121 = vmatpush.msra.mxu0 %v1811_v22  ;;  %142 = vmatpush.msra.mxu1 %v1821_v25  ;;  %v1852_v36 = vld [vmem:[#allocation7 + $0xd8] sm:$0xff]  ;;  %v1857_v37 = vld [vmem:[#allocation7 + $0xe8] sm:$0xff]  ;;  %v1859_v38 = vld [vmem:[#allocation7 + $0xe0] sm:$0xff] }
  0x19   :  { %163 = vmatpush.msra.mxu2 %v1814_v23  ;;  %183 = vmatpush.msra.mxu3 %v1816_v24  ;;  %v1862_v39 = vld [vmem:[#allocation7 + $0xb0] sm:$0xff]  ;;  %v1864_v40 = vld [vmem:[#allocation7 + $0xb8] sm:$0xff]  ;;  %v1869_v41 = vld [vmem:[#allocation7 + $0xc8] sm:$0xff] }
  0x1a   :  { %122 = vmatpush.msra.mxu0 %v1823_v26  ;;  %143 = vmatpush.msra.mxu1 %v1833_v29  ;;  %v1871_v42 = vld [vmem:[#allocation7 + $0xc0] sm:$0xff]  ;;  %v1874_v43 = vld [vmem:[#allocation7 + $0x90] sm:$0xff]  ;;  %v1876_v44 = vld [vmem:[#allocation7 + $0x98] sm:$0xff] }
  0x1b   :  { %164 = vmatpush.msra.mxu2 %v1826_v27  ;;  %184 = vmatpush.msra.mxu3 %v1828_v28  ;;  %2634 = vst [vmem:[#allocation13_spill] sm:$0xff] %v1874_v43  ;;  %v1881_v45 = vld [vmem:[#allocation7 + $0xa8] sm:$0xff]  ;;  %v1883_v46 = vld [vmem:[#allocation7 + $0xa0] sm:$0xff]  ;;  %v1886_v47 = vld [vmem:[#allocation7 + $0x70] sm:$0xff] }
  0x1c   :  { %123 = vmatpush.msra.mxu0 %v1835_v30  ;;  %144 = vmatpush.msra.mxu1 %v1845_v33  ;;  %2635 = vst [vmem:[#allocation14_spill] sm:$0xff] %v1876_v44  ;;  %v1888_v48 = vld [vmem:[#allocation7 + $0x78] sm:$0xff]  ;;  %v1893_v49 = vld [vmem:[#allocation7 + $0x88] sm:$0xff]  ;;  %v1895_v50 = vld [vmem:[#allocation7 + $0x80] sm:$0xff] }
  0x1d   :  { %165 = vmatpush.msra.mxu2 %v1838_v31  ;;  %185 = vmatpush.msra.mxu3 %v1840_v32  ;;  %2636 = vst [vmem:[#allocation15_spill] sm:$0xff] %v1886_v47  ;;  %v1898_v51 = vld [vmem:[#allocation7 + $0x50] sm:$0xff]  ;;  %v1900_v52 = vld [vmem:[#allocation7 + $0x58] sm:$0xff]  ;;  %v1905_v53 = vld [vmem:[#allocation7 + $0x68] sm:$0xff] }
  0x1e   :  { %124 = vmatpush.msra.mxu0 %v1847_v34  ;;  %145 = vmatpush.msra.mxu1 %v1857_v37  ;;  %2637 = vst [vmem:[#allocation16_spill] sm:$0xff] %v1888_v48  ;;  %v1907_v54 = vld [vmem:[#allocation7 + $0x60] sm:$0xff]  ;;  %v1910_v55 = vld [vmem:[#allocation7 + $0x30] sm:$0xff]  ;;  %v1912_v56 = vld [vmem:[#allocation7 + $0x38] sm:$0xff] }
  0x1f   :  { %166 = vmatpush.msra.mxu2 %v1850_v35  ;;  %186 = vmatpush.msra.mxu3 %v1852_v36  ;;  %2638 = vst [vmem:[#allocation17_spill] sm:$0xff] %v1893_v49  ;;  %v1917_v57 = vld [vmem:[#allocation7 + $0x48] sm:$0xff]  ;;  %v1919_v58 = vld [vmem:[#allocation7 + $0x40] sm:$0xff]  ;;  %v1922_v59 = vld [vmem:[#allocation7 + $0x10] sm:$0xff] }
  0x20   :  { %125 = vmatpush.msra.mxu0 %v1859_v38  ;;  %146 = vmatpush.msra.mxu1 %v1869_v41  ;;  %2639 = vst [vmem:[#allocation18_spill] sm:$0xff] %v1898_v51  ;;  %v1924_v60 = vld [vmem:[#allocation7 + $0x18] sm:$0xff]  ;;  %v1931_v62 = vld [vmem:[#allocation7 + $0x28] sm:$0xff]  ;;  %v1933_v63 = vld [vmem:[#allocation7 + $0x20] sm:$0xff] }
  0x21   :  { %167 = vmatpush.msra.mxu2 %v1862_v39  ;;  %187 = vmatpush.msra.mxu3 %v1864_v40  ;;  %2640 = vst [vmem:[#allocation19_spill] sm:$0xff] %v1900_v52  ;;  %v50_v61 = vld [vmem:[#allocation2] sm:$0x3]  ;;  %v1937_v0 = vld [vmem:[#allocation7 + $0x8] sm:$0xff] }
  0x22   :  { %126 = vmatpush.msra.mxu0 %v1871_v42  ;;  %147 = vmatpush.msra.mxu1 %v1881_v45  ;;  %2641 = vst [vmem:[#allocation20_spill] sm:$0xff] %v1905_v53 }
  0x23   :  { %168 = vmatpush.msra.mxu2 %v1874_v43  ;;  %188 = vmatpush.msra.mxu3 %v1876_v44  ;;  %2642 = vst [vmem:[#allocation21_spill] sm:$0xff] %v1907_v54 }
  0x24   :  { %127 = vmatpush.msra.mxu0 %v1883_v46  ;;  %148 = vmatpush.msra.mxu1 %v1893_v49  ;;  %2643 = vst [vmem:[#allocation22_spill] sm:$0xff] %v1910_v55 }
  0x25   :  { %169 = vmatpush.msra.mxu2 %v1886_v47  ;;  %189 = vmatpush.msra.mxu3 %v1888_v48  ;;  %2644 = vst [vmem:[#allocation23_spill] sm:$0xff] %v1912_v56 }
  0x26   :  { %128 = vmatpush.msra.mxu0 %v1895_v50  ;;  %2645 = vst [vmem:[#allocation24_spill] sm:$0xff] %v1917_v57  ;;  %149 = vmatpush.msra.mxu1 %v1905_v53 }
  0x27   :  { %170 = vmatpush.msra.mxu2 %v1898_v51  ;;  %190 = vmatpush.msra.mxu3 %v1900_v52  ;;  %2646 = vst [vmem:[#allocation25_spill] sm:$0xff] %v1919_v58 }
  0x28   :  { %2647 = vst [vmem:[#allocation26_spill] sm:$0xff] %v1922_v59  ;;  %129 = vmatpush.msra.mxu0 %v1907_v54  ;;  %150 = vmatpush.msra.mxu1 %v1917_v57 }
  0x29   :  { %2648 = vst [vmem:[#allocation27_spill] sm:$0xff] %v1924_v60  ;;  %171 = vmatpush.msra.mxu2 %v1910_v55  ;;  %191 = vmatpush.msra.mxu3 %v1912_v56  ;;  %v1939_v55 = vld [vmem:[#allocation7] sm:$0xff] }
  0x2a   :  { %130 = vmatpush.msra.mxu0 %v1919_v58  ;;  %2649 = vst [vmem:[#allocation28_spill] sm:$0xff] %v1931_v62  ;;  %151 = vmatpush.msra.mxu1 %v1931_v62 }
  0x2b   :  { %2650 = vst [vmem:[#allocation29_spill] sm:$0xff] %v1933_v63  ;;  %172 = vmatpush.msra.mxu2 %v1922_v59  ;;  %192 = vmatpush.msra.mxu3 %v1924_v60 }
  0x2c   :  { %173 = vmatmul.f32.vlgmr.msra.gmra.mxu2 %v50_v61  ;;  %193 = vmatmul.f32.vlgmr.msra.gmra.mxu3 %v50_v61  ;;  %2651 = vst [vmem:[#allocation30_spill] sm:$0xff] %v1937_v0 }
  0x2d   :  { %2652 = vst [vmem:[#allocation31_spill] sm:$0xff] %v1939_v55  ;;  %131 = vmatpush.msra.mxu0 %v1933_v63  ;;  %344 = vmatpush.msrb.mxu2 %v1753_v1 }
  0x2e   :  { %364 = vmatpush.msrb.mxu3 %v1755_v2  ;;  %152 = vmatpush.msra.mxu1 %v1937_v0 }
  0x2f   :  { %132 = vmatpush.msra.mxu0 %v1939_v55  ;;  %153 = vmatmul.f32.vlgmr.msra.gmra.mxu1 %v50_v61 }
  0x30   :  { %133 = vmatmul.f32.vlgmr.msra.gmra.mxu0 %v50_v61  ;;  %324 = vmatpush.msrb.mxu1 %v1767_v7  ;;  %v2653_v61 = vld [vmem:[#allocation22_spill] sm:$0xff] }
  0x31   :  { %304 = vmatpush.msrb.mxu0 %v1771_v8  ;;  %345 = vmatpush.msrb.mxu2 %v1757_v3 }
  0x32   :  { %365 = vmatpush.msrb.mxu3 %v1761_v4  ;;  %325 = vmatpush.msrb.mxu1 %v1773_v9 }
  0x33   :  { %305 = vmatpush.msrb.mxu0 %v1781_v12  ;;  %346 = vmatpush.msrb.mxu2 %v1763_v5 }
  0x34   :  { %366 = vmatpush.msrb.mxu3 %v1765_v6  ;;  %326 = vmatpush.msrb.mxu1 %v1785_v13 }
  0x35   :  { %306 = vmatpush.msrb.mxu0 %v1787_v14  ;;  %347 = vmatpush.msrb.mxu2 %v1776_v10 }
  0x36   :  { %367 = vmatpush.msrb.mxu3 %v1778_v11  ;;  %327 = vmatpush.msrb.mxu1 %v1797_v17 }
  0x37   :  { %307 = vmatpush.msrb.mxu0 %v1799_v18  ;;  %348 = vmatpush.msrb.mxu2 %v1790_v15 }
  0x38   :  { %368 = vmatpush.msrb.mxu3 %v1792_v16  ;;  %328 = vmatpush.msrb.mxu1 %v1809_v21 }
  0x39   :  { %308 = vmatpush.msrb.mxu0 %v1811_v22  ;;  %349 = vmatpush.msrb.mxu2 %v1802_v19 }
  0x3a   :  { %369 = vmatpush.msrb.mxu3 %v1804_v20  ;;  %329 = vmatpush.msrb.mxu1 %v1821_v25 }
  0x3b   :  { %309 = vmatpush.msrb.mxu0 %v1823_v26  ;;  %350 = vmatpush.msrb.mxu2 %v1814_v23 }
  0x3c   :  { %370 = vmatpush.msrb.mxu3 %v1816_v24  ;;  %330 = vmatpush.msrb.mxu1 %v1833_v29 }
  0x3d   :  { %310 = vmatpush.msrb.mxu0 %v1835_v30  ;;  %351 = vmatpush.msrb.mxu2 %v1826_v27 }
  0x3e   :  { %371 = vmatpush.msrb.mxu3 %v1828_v28  ;;  %331 = vmatpush.msrb.mxu1 %v1845_v33 }
  0x3f   :  { %311 = vmatpush.msrb.mxu0 %v1847_v34  ;;  %352 = vmatpush.msrb.mxu2 %v1838_v31 }
  0x40   :  { %372 = vmatpush.msrb.mxu3 %v1840_v32  ;;  %332 = vmatpush.msrb.mxu1 %v1857_v37 }
  0x41   :  { %312 = vmatpush.msrb.mxu0 %v1859_v38  ;;  %353 = vmatpush.msrb.mxu2 %v1850_v35 }
  0x42   :  { %373 = vmatpush.msrb.mxu3 %v1852_v36  ;;  %333 = vmatpush.msrb.mxu1 %v1869_v41 }
  0x43   :  { %313 = vmatpush.msrb.mxu0 %v1871_v42  ;;  %354 = vmatpush.msrb.mxu2 %v1862_v39 }
  0x44   :  { %374 = vmatpush.msrb.mxu3 %v1864_v40  ;;  %334 = vmatpush.msrb.mxu1 %v1881_v45 }
  0x45   :  { %314 = vmatpush.msrb.mxu0 %v1883_v46  ;;  %355 = vmatpush.msrb.mxu2 %v1874_v43 }
  0x46   :  { %375 = vmatpush.msrb.mxu3 %v1876_v44  ;;  %335 = vmatpush.msrb.mxu1 %v1893_v49 }
  0x47   :  { %315 = vmatpush.msrb.mxu0 %v1895_v50  ;;  %356 = vmatpush.msrb.mxu2 %v1886_v47 }
  0x48   :  { %376 = vmatpush.msrb.mxu3 %v1888_v48  ;;  %336 = vmatpush.msrb.mxu1 %v1905_v53 }
  0x49   :  { %316 = vmatpush.msrb.mxu0 %v1907_v54  ;;  %357 = vmatpush.msrb.mxu2 %v1898_v51 }
  0x4a   :  { %377 = vmatpush.msrb.mxu3 %v1900_v52  ;;  %337 = vmatpush.msrb.mxu1 %v1917_v57 }
  0x4b   :  { %317 = vmatpush.msrb.mxu0 %v1919_v58  ;;  %358 = vmatpush.msrb.mxu2 %v2653_v61 }
  0x4c   :  { %378 = vmatpush.msrb.mxu3 %v1912_v56  ;;  %338 = vmatpush.msrb.mxu1 %v1931_v62 }
  0x4d   :  { %318 = vmatpush.msrb.mxu0 %v1933_v63  ;;  %359 = vmatpush.msrb.mxu2 %v1922_v59 }
  0x4e   :  { %379 = vmatpush.msrb.mxu3 %v1924_v60  ;;  %339 = vmatpush.msrb.mxu1 %v1937_v0 }
  0x4f   :  { %319 = vmatpush.msrb.mxu0 %v1939_v55  ;;  %529 = vmatpush.msra.mxu2 %v1753_v1 }
  0x50   :  { %509 = vmatpush.msra.mxu1 %v1767_v7  ;;  %549 = vmatpush.msra.mxu3 %v1755_v2 }
  0x51   :  { %489 = vmatpush.msra.mxu0 %v1771_v8  ;;  %530 = vmatpush.msra.mxu2 %v1757_v3 }
  0x52   :  { %510 = vmatpush.msra.mxu1 %v1773_v9  ;;  %550 = vmatpush.msra.mxu3 %v1761_v4 }
  0x53   :  { %490 = vmatpush.msra.mxu0 %v1781_v12  ;;  %531 = vmatpush.msra.mxu2 %v1763_v5 }
  0x54   :  { %511 = vmatpush.msra.mxu1 %v1785_v13  ;;  %551 = vmatpush.msra.mxu3 %v1765_v6 }
  0x55   :  { %491 = vmatpush.msra.mxu0 %v1787_v14  ;;  %532 = vmatpush.msra.mxu2 %v1776_v10 }
  0x56   :  { %512 = vmatpush.msra.mxu1 %v1797_v17  ;;  %552 = vmatpush.msra.mxu3 %v1778_v11 }
  0x57   :  { %492 = vmatpush.msra.mxu0 %v1799_v18  ;;  %533 = vmatpush.msra.mxu2 %v1790_v15 }
  0x58   :  { %513 = vmatpush.msra.mxu1 %v1809_v21  ;;  %553 = vmatpush.msra.mxu3 %v1792_v16 }
  0x59   :  { %493 = vmatpush.msra.mxu0 %v1811_v22  ;;  %534 = vmatpush.msra.mxu2 %v1802_v19 }
  0x5a   :  { %514 = vmatpush.msra.mxu1 %v1821_v25  ;;  %554 = vmatpush.msra.mxu3 %v1804_v20 }
  0x5b   :  { %494 = vmatpush.msra.mxu0 %v1823_v26  ;;  %535 = vmatpush.msra.mxu2 %v1814_v23 }
  0x5c   :  { %515 = vmatpush.msra.mxu1 %v1833_v29  ;;  %555 = vmatpush.msra.mxu3 %v1816_v24 }
  0x5d   :  { %495 = vmatpush.msra.mxu0 %v1835_v30  ;;  %536 = vmatpush.msra.mxu2 %v1826_v27 }
  0x5e   :  { %516 = vmatpush.msra.mxu1 %v1845_v33  ;;  %556 = vmatpush.msra.mxu3 %v1828_v28 }
  0x5f   :  { %496 = vmatpush.msra.mxu0 %v1847_v34  ;;  %537 = vmatpush.msra.mxu2 %v1838_v31 }
  0x60   :  { %517 = vmatpush.msra.mxu1 %v1857_v37  ;;  %557 = vmatpush.msra.mxu3 %v1840_v32 }
  0x61   :  { %497 = vmatpush.msra.mxu0 %v1859_v38  ;;  %538 = vmatpush.msra.mxu2 %v1850_v35 }
  0x62   :  { %518 = vmatpush.msra.mxu1 %v1869_v41  ;;  %558 = vmatpush.msra.mxu3 %v1852_v36 }
  0x63   :  { %498 = vmatpush.msra.mxu0 %v1871_v42  ;;  %539 = vmatpush.msra.mxu2 %v1862_v39 }
  0x64   :  { %519 = vmatpush.msra.mxu1 %v1881_v45  ;;  %559 = vmatpush.msra.mxu3 %v1864_v40 }
  0x65   :  { %499 = vmatpush.msra.mxu0 %v1883_v46  ;;  %540 = vmatpush.msra.mxu2 %v1874_v43 }
  0x66   :  { %520 = vmatpush.msra.mxu1 %v1893_v49  ;;  %560 = vmatpush.msra.mxu3 %v1876_v44  ;;  %v51_v49 = vld [vmem:[#allocation3] sm:$0x3] }
  0x67   :  { %500 = vmatpush.msra.mxu0 %v1895_v50  ;;  %541 = vmatpush.msra.mxu2 %v1886_v47 }
  0x68   :  { %521 = vmatpush.msra.mxu1 %v1905_v53  ;;  %561 = vmatpush.msra.mxu3 %v1888_v48 }
  0x69   :  { %501 = vmatpush.msra.mxu0 %v1907_v54  ;;  %542 = vmatpush.msra.mxu2 %v1898_v51 }
  0x6a   :  { %522 = vmatpush.msra.mxu1 %v1917_v57  ;;  %562 = vmatpush.msra.mxu3 %v1900_v52 }
  0x6b   :  { %502 = vmatpush.msra.mxu0 %v1919_v58  ;;  %543 = vmatpush.msra.mxu2 %v2653_v61 }
  0x6c   :  { %523 = vmatpush.msra.mxu1 %v1931_v62  ;;  %563 = vmatpush.msra.mxu3 %v1912_v56  ;;  %v52_v56 = vld [vmem:[#allocation4] sm:$0xff] }
  0x6d   :  { %503 = vmatpush.msra.mxu0 %v1933_v63  ;;  %544 = vmatpush.msra.mxu2 %v1922_v59 }
  0x6e   :  { %524 = vmatpush.msra.mxu1 %v1937_v0  ;;  %564 = vmatpush.msra.mxu3 %v1924_v60 }
  0x6f   :  { %504 = vmatpush.msra.mxu0 %v1939_v55 }
  0xac   :  { %v154_v57 = vpop.f32.mrf.mxu1 }
  0xad   :  { %v134_v51 = vpop.f32.mrf.mxu0  ;;  %v201_v52 = vrot.slane %v154_v57, 6 }
  0xaf   :  { %v174_v58 = vpop.f32.mrf.mxu2  ;;  %v194_v63 = vpop.f32.mrf.mxu3  ;;  %v205_v61 = vsel %vm204_vm0, %v134_v51, %v201_v52 }
  0xb0   :  { %v202_v62 = vrot.slane %v174_v58, 4  ;;  %v203_v48 = vrot.slane %v194_v63, 2 }
  0xb2   :  { %v207_v55 = vsel %vm206_vm1, %v202_v62, %v203_v48 }
  0xb3   :  { %v209_v0 = vsel %vm208_vm2, %v205_v61, %v207_v55 }
  0xb4   :  { %v211_v59 = vadd.f32 %v209_v0, %v52_v56 }
  0xb6   :  { %v212_v47 = vmul.f32 0.5, %v211_v59  ;;  %v217_v60 = vrot.slane %v211_v59, 2  ;;  %v226_v54 = vrot.slane %v211_v59, 6  ;;  %v223_v57 = vrot.slane %v211_v59, 4 }
  0xb8   :  { %1564 = vtanh.f32 %v212_v47  ;;  %v219_v53 = vmul.f32 0.5, %v217_v60  ;;  %v228_v44 = vmul.f32 0.5, %v226_v54 }
  0xba   :  { %1566 = vtanh.f32 %v219_v53 }
  0xbb   :  { %1568 = vtanh.f32 %v223_v57 }
  0xbc   :  { %1570 = vtanh.f32 %v228_v44 }
  0xbe   :  { %v1565_v43 = vpop.eup %1564 }
  0xbf   :  { %v214_v58 = vmul.f32 0.5, %v1565_v43 }
  0xc0   :  { %v1567_v63 = vpop.eup %1566 }
  0xc1   :  { %v215_v51 = vadd.f32 0.5, %v214_v58  ;;  %v221_v52 = vmul.f32 0.5, %v1567_v63  ;;  %v1569_v62 = vpop.eup %1568 }
  0xc2   :  { %v1571_v0 = vpop.eup %1570 }
  0xc3   :  { %v222_v48 = vadd.f32 0.5, %v221_v52  ;;  %v233_v56 = vmul.f32 %v1569_v62, %v215_v51  ;;  %v230_v47 = vmul.f32 0.5, %v1571_v0 }
  0xc5   :  { %v232_v55 = vmul.f32 %v222_v48, %v51_v49  ;;  %v231_v53 = vadd.f32 0.5, %v230_v47 }
  0xc7   :  { %v2076_v61 = vadd.f32 %v233_v56, %v232_v55 }
  0xc9   :  { %1572 = vtanh.f32 %v2076_v61 }
  0xcf   :  { %v1573_v54 = vpop.eup %1572 }
  0xd0   :  { %v236_v59 = vmul.f32 %v1573_v54, %v231_v53 }
  0xd2   :  { %237 = vst [vmem:[#allocation9] sm:$0x3] %v236_v59  ;;  %320 = vmatmul.f32.vlgmr.msrb.gmra.mxu0 %v236_v59  ;;  %340 = vmatmul.f32.vlgmr.msrb.gmra.mxu1 %v236_v59 }
  0xd3   :  { %360 = vmatmul.f32.vlgmr.msrb.gmra.mxu2 %v236_v59  ;;  %380 = vmatmul.f32.vlgmr.msrb.gmra.mxu3 %v236_v59 }
  0xd4   :  { %674 = vmatpush.msrb.mxu0 %v1771_v8  ;;  %694 = vmatpush.msrb.mxu1 %v1767_v7  ;;  %v2660_v7 = vld [vmem:[#allocation16_spill] sm:$0xff]  ;;  %v2661_v8 = vld [vmem:[#allocation25_spill] sm:$0xff] }
  0xd5   :  { %714 = vmatpush.msrb.mxu2 %v1753_v1  ;;  %734 = vmatpush.msrb.mxu3 %v1755_v2  ;;  %v2654_v1 = vld [vmem:[#allocation17_spill] sm:$0xff] }
  0xd6   :  { %675 = vmatpush.msrb.mxu0 %v1781_v12  ;;  %695 = vmatpush.msrb.mxu1 %v1773_v9  ;;  %v2655_v2 = vld [vmem:[#allocation13_spill] sm:$0xff]  ;;  %v2662_v9 = vld [vmem:[#allocation24_spill] sm:$0xff] }
  0xd7   :  { %715 = vmatpush.msrb.mxu2 %v1757_v3  ;;  %735 = vmatpush.msrb.mxu3 %v1761_v4  ;;  %v2656_v3 = vld [vmem:[#allocation14_spill] sm:$0xff]  ;;  %v2657_v4 = vld [vmem:[#allocation21_spill] sm:$0xff] }
  0xd8   :  { %676 = vmatpush.msrb.mxu0 %v1787_v14  ;;  %696 = vmatpush.msrb.mxu1 %v1785_v13  ;;  %v2665_v12 = vld [vmem:[#allocation29_spill] sm:$0xff]  ;;  %v2666_v13 = vld [vmem:[#allocation28_spill] sm:$0xff]  ;;  %v2667_v14 = vld [vmem:[#allocation22_spill] sm:$0xff] }
  0xd9   :  { %716 = vmatpush.msrb.mxu2 %v1763_v5  ;;  %736 = vmatpush.msrb.mxu3 %v1765_v6  ;;  %v2658_v5 = vld [vmem:[#allocation20_spill] sm:$0xff]  ;;  %v2659_v6 = vld [vmem:[#allocation15_spill] sm:$0xff] }
  0xda   :  { %677 = vmatpush.msrb.mxu0 %v1799_v18  ;;  %697 = vmatpush.msrb.mxu1 %v1797_v17  ;;  %v2670_v17 = vld [vmem:[#allocation30_spill] sm:$0xff] }
  0xdb   :  { %717 = vmatpush.msrb.mxu2 %v1776_v10  ;;  %737 = vmatpush.msrb.mxu3 %v1778_v11  ;;  %v2663_v10 = vld [vmem:[#allocation18_spill] sm:$0xff]  ;;  %v2664_v11 = vld [vmem:[#allocation19_spill] sm:$0xff] }
  0xdc   :  { %678 = vmatpush.msrb.mxu0 %v1811_v22  ;;  %698 = vmatpush.msrb.mxu1 %v1809_v21  ;;  %v2671_v18 = vld [vmem:[#allocation26_spill] sm:$0xff] }
  0xdd   :  { %718 = vmatpush.msrb.mxu2 %v1790_v15  ;;  %738 = vmatpush.msrb.mxu3 %v1792_v16  ;;  %v2668_v15 = vld [vmem:[#allocation23_spill] sm:$0xff] }
  0xde   :  { %679 = vmatpush.msrb.mxu0 %v1823_v26  ;;  %699 = vmatpush.msrb.mxu1 %v1821_v25  ;;  %v2669_v16 = vld [vmem:[#allocation31_spill] sm:$0xff] }
  0xdf   :  { %719 = vmatpush.msrb.mxu2 %v1802_v19  ;;  %739 = vmatpush.msrb.mxu3 %v1804_v20  ;;  %v2672_v19 = vld [vmem:[#allocation27_spill] sm:$0xff] }
  0xe0   :  { %680 = vmatpush.msrb.mxu0 %v1835_v30  ;;  %700 = vmatpush.msrb.mxu1 %v1833_v29 }
  0xe1   :  { %720 = vmatpush.msrb.mxu2 %v1814_v23  ;;  %740 = vmatpush.msrb.mxu3 %v1816_v24 }
  0xe2   :  { %681 = vmatpush.msrb.mxu0 %v1847_v34  ;;  %701 = vmatpush.msrb.mxu1 %v1845_v33 }
  0xe3   :  { %721 = vmatpush.msrb.mxu2 %v1826_v27  ;;  %741 = vmatpush.msrb.mxu3 %v1828_v28  ;;  %v239_v27 = vld [vmem:[#allocation4 + $0x8] sm:$0xff] }
  0xe4   :  { %682 = vmatpush.msrb.mxu0 %v1859_v38  ;;  %702 = vmatpush.msrb.mxu1 %v1857_v37 }
  0xe5   :  { %722 = vmatpush.msrb.mxu2 %v1838_v31  ;;  %742 = vmatpush.msrb.mxu3 %v1840_v32 }
  0xe6   :  { %683 = vmatpush.msrb.mxu0 %v1871_v42  ;;  %703 = vmatpush.msrb.mxu1 %v1869_v41 }
  0xe7   :  { %723 = vmatpush.msrb.mxu2 %v1850_v35  ;;  %743 = vmatpush.msrb.mxu3 %v1852_v36 }
  0xe8   :  { %684 = vmatpush.msrb.mxu0 %v1883_v46  ;;  %704 = vmatpush.msrb.mxu1 %v1881_v45 }
  0xe9   :  { %724 = vmatpush.msrb.mxu2 %v1862_v39  ;;  %744 = vmatpush.msrb.mxu3 %v1864_v40 }
  0xea   :  { %685 = vmatpush.msrb.mxu0 %v1895_v50  ;;  %705 = vmatpush.msrb.mxu1 %v2654_v1 }
  0xeb   :  { %725 = vmatpush.msrb.mxu2 %v2655_v2  ;;  %745 = vmatpush.msrb.mxu3 %v2656_v3 }
  0xec   :  { %686 = vmatpush.msrb.mxu0 %v2657_v4  ;;  %706 = vmatpush.msrb.mxu1 %v2658_v5 }
  0xed   :  { %726 = vmatpush.msrb.mxu2 %v2659_v6  ;;  %746 = vmatpush.msrb.mxu3 %v2660_v7 }
  0xee   :  { %687 = vmatpush.msrb.mxu0 %v2661_v8  ;;  %707 = vmatpush.msrb.mxu1 %v2662_v9 }
  0xef   :  { %727 = vmatpush.msrb.mxu2 %v2663_v10  ;;  %747 = vmatpush.msrb.mxu3 %v2664_v11 }
  0xf0   :  { %688 = vmatpush.msrb.mxu0 %v2665_v12  ;;  %708 = vmatpush.msrb.mxu1 %v2666_v13 }
  0xf1   :  { %728 = vmatpush.msrb.mxu2 %v2667_v14  ;;  %748 = vmatpush.msrb.mxu3 %v2668_v15 }
  0xf2   :  { %689 = vmatpush.msrb.mxu0 %v2669_v16  ;;  %709 = vmatpush.msrb.mxu1 %v2670_v17 }
  0xf3   :  { %729 = vmatpush.msrb.mxu2 %v2671_v18  ;;  %749 = vmatpush.msrb.mxu3 %v2672_v19 }
 0x14f   :  { %v341_v20 = vpop.f32.mrf.mxu1  ;;  %v321_v26 = vpop.f32.mrf.mxu0 }
 0x150   :  { %v388_v21 = vrot.slane %v341_v20, 6 }
 0x152   :  { %v391_v28 = vsel %vm204_vm0, %v321_v26, %v388_v21  ;;  %v2165_v26 = vld [vmem:[#allocation7 + $0x1c0] sm:$0xff] }
 0x156   :  { %v361_v22 = vpop.f32.mrf.mxu2  ;;  %v381_v23 = vpop.f32.mrf.mxu3 }
 0x157   :  { %v389_v24 = vrot.slane %v361_v22, 4  ;;  %v390_v25 = vrot.slane %v381_v23, 2  ;;  %v2153_v22 = vld [vmem:[#allocation7 + $0x1e0] sm:$0xff]  ;;  %v2155_v23 = vld [vmem:[#allocation7 + $0x1e8] sm:$0xff] }
 0x159   :  { %v392_v29 = vsel %vm206_vm1, %v389_v24, %v390_v25  ;;  %v2157_v24 = vld [vmem:[#allocation7 + $0x1f0] sm:$0xff]  ;;  %v2161_v25 = vld [vmem:[#allocation7 + $0x1f8] sm:$0xff] }
 0x15a   :  { %v393_v30 = vsel %vm208_vm2, %v391_v28, %v392_v29  ;;  %v2169_v28 = vld [vmem:[#allocation7 + $0x1d0] sm:$0xff]  ;;  %v2173_v29 = vld [vmem:[#allocation7 + $0x1d8] sm:$0xff] }
 0x15b   :  { %v395_v31 = vadd.f32 %v393_v30, %v239_v27  ;;  %v2167_v27 = vld [vmem:[#allocation7 + $0x1c8] sm:$0xff]  ;;  %v2177_v30 = vld [vmem:[#allocation7 + $0x1a0] sm:$0xff] }
 0x15d   :  { %v396_v32 = vmul.f32 0.5, %v395_v31  ;;  %v401_v33 = vrot.slane %v395_v31, 2  ;;  %v410_v35 = vrot.slane %v395_v31, 6  ;;  %v407_v36 = vrot.slane %v395_v31, 4  ;;  %v2179_v31 = vld [vmem:[#allocation7 + $0x1a8] sm:$0xff] }
 0x15f   :  { %1574 = vtanh.f32 %v396_v32  ;;  %v403_v34 = vmul.f32 0.5, %v401_v33  ;;  %v412_v37 = vmul.f32 0.5, %v410_v35  ;;  %v2181_v32 = vld [vmem:[#allocation7 + $0x1b0] sm:$0xff]  ;;  %v2185_v33 = vld [vmem:[#allocation7 + $0x1b8] sm:$0xff]  ;;  %v2191_v35 = vld [vmem:[#allocation7 + $0x188] sm:$0xff] }
 0x161   :  { %1576 = vtanh.f32 %v403_v34  ;;  %v2189_v34 = vld [vmem:[#allocation7 + $0x180] sm:$0xff] }
 0x162   :  { %1578 = vtanh.f32 %v407_v36  ;;  %v2193_v36 = vld [vmem:[#allocation7 + $0x190] sm:$0xff] }
 0x163   :  { %1580 = vtanh.f32 %v412_v37  ;;  %v2197_v37 = vld [vmem:[#allocation7 + $0x198] sm:$0xff] }
 0x165   :  { %v1575_v38 = vpop.eup %1574 }
 0x166   :  { %v398_v39 = vmul.f32 0.5, %v1575_v38  ;;  %v2201_v38 = vld [vmem:[#allocation7 + $0x160] sm:$0xff] }
 0x167   :  { %v1577_v40 = vpop.eup %1576 }
 0x168   :  { %v399_v41 = vadd.f32 0.5, %v398_v39  ;;  %v405_v42 = vmul.f32 0.5, %v1577_v40  ;;  %v1579_v44 = vpop.eup %1578  ;;  %v2203_v39 = vld [vmem:[#allocation7 + $0x168] sm:$0xff]  ;;  %v2205_v40 = vld [vmem:[#allocation7 + $0x170] sm:$0xff] }
 0x169   :  { %v1581_v49 = vpop.eup %1580 }
 0x16a   :  { %v406_v43 = vadd.f32 0.5, %v405_v42  ;;  %v417_v46 = vmul.f32 %v1579_v44, %v399_v41  ;;  %v414_v60 = vmul.f32 0.5, %v1581_v49  ;;  %v2209_v41 = vld [vmem:[#allocation7 + $0x178] sm:$0xff]  ;;  %v2213_v42 = vld [vmem:[#allocation7 + $0x140] sm:$0xff]  ;;  %v2217_v44 = vld [vmem:[#allocation7 + $0x150] sm:$0xff] }
 0x16b   :  { %v2227_v49 = vld [vmem:[#allocation7 + $0x128] sm:$0xff] }
 0x16c   :  { %v416_v45 = vmul.f32 %v406_v43, %v2076_v61  ;;  %v415_v57 = vadd.f32 0.5, %v414_v60  ;;  %v424_v61 = vld [vmem:[#allocation4 + $0x10] sm:$0xff]  ;;  %v2215_v43 = vld [vmem:[#allocation7 + $0x148] sm:$0xff]  ;;  %v2233_v60 = vld [vmem:[#allocation7 + $0x138] sm:$0xff] }
 0x16e   :  { %v418_v50 = vadd.f32 %v417_v46, %v416_v45  ;;  %v2221_v45 = vld [vmem:[#allocation7 + $0x158] sm:$0xff]  ;;  %v2225_v46 = vld [vmem:[#allocation7 + $0x120] sm:$0xff] }
 0x170   :  { %1582 = vtanh.f32 %v418_v50 }
 0x176   :  { %v1583_v58 = vpop.eup %1582 }
 0x177   :  { %v420_v63 = vmul.f32 %v1583_v58, %v415_v57  ;;  %v2237_v57 = vld [vmem:[#allocation7 + $0x100] sm:$0xff]  ;;  %v2239_v58 = vld [vmem:[#allocation7 + $0x108] sm:$0xff] }
 0x179   :  { %422 = vst [vmem:[#allocation9 + $0x2] sm:$0x3] %v420_v63  ;;  %505 = vmatmul.f32.vlgmr.msra.gmra.mxu0 %v420_v63  ;;  %525 = vmatmul.f32.vlgmr.msra.gmra.mxu1 %v420_v63 }
 0x17a   :  { %545 = vmatmul.f32.vlgmr.msra.gmra.mxu2 %v420_v63  ;;  %565 = vmatmul.f32.vlgmr.msra.gmra.mxu3 %v420_v63  ;;  %v2241_v63 = vld [vmem:[#allocation7 + $0x110] sm:$0xff] }
 0x17b   :  { %859 = vmatpush.msra.mxu0 %v2153_v22  ;;  %879 = vmatpush.msra.mxu1 %v2155_v23 }
 0x17c   :  { %899 = vmatpush.msra.mxu2 %v2157_v24  ;;  %919 = vmatpush.msra.mxu3 %v2161_v25 }
 0x17d   :  { %860 = vmatpush.msra.mxu0 %v2165_v26  ;;  %880 = vmatpush.msra.mxu1 %v2167_v27 }
 0x17e   :  { %900 = vmatpush.msra.mxu2 %v2169_v28  ;;  %920 = vmatpush.msra.mxu3 %v2173_v29 }
 0x17f   :  { %861 = vmatpush.msra.mxu0 %v2177_v30  ;;  %881 = vmatpush.msra.mxu1 %v2179_v31 }
 0x180   :  { %901 = vmatpush.msra.mxu2 %v2181_v32  ;;  %921 = vmatpush.msra.mxu3 %v2185_v33 }
 0x181   :  { %862 = vmatpush.msra.mxu0 %v2189_v34  ;;  %882 = vmatpush.msra.mxu1 %v2191_v35 }
 0x182   :  { %902 = vmatpush.msra.mxu2 %v2193_v36  ;;  %922 = vmatpush.msra.mxu3 %v2197_v37 }
 0x183   :  { %863 = vmatpush.msra.mxu0 %v2201_v38  ;;  %883 = vmatpush.msra.mxu1 %v2203_v39 }
 0x184   :  { %903 = vmatpush.msra.mxu2 %v2205_v40  ;;  %923 = vmatpush.msra.mxu3 %v2209_v41 }
 0x185   :  { %864 = vmatpush.msra.mxu0 %v2213_v42  ;;  %884 = vmatpush.msra.mxu1 %v2215_v43 }
 0x186   :  { %904 = vmatpush.msra.mxu2 %v2217_v44  ;;  %924 = vmatpush.msra.mxu3 %v2221_v45 }
 0x187   :  { %865 = vmatpush.msra.mxu0 %v2225_v46  ;;  %885 = vmatpush.msra.mxu1 %v2227_v49 }
 0x188   :  { %925 = vmatpush.msra.mxu3 %v2233_v60 }
 0x189   :  { %866 = vmatpush.msra.mxu0 %v2237_v57  ;;  %886 = vmatpush.msra.mxu1 %v2239_v58 }
 0x1f6   :  { %v526_v51 = vpop.f32.mrf.mxu1  ;;  %v506_v0 = vpop.f32.mrf.mxu0 }
 0x1f7   :  { %v573_v52 = vrot.slane %v526_v51, 6  ;;  %v2245_v51 = vld [vmem:[#allocation7 + $0x118] sm:$0xff] }
 0x1f8   :  { %926 = vmatpush.msra.mxu3 %v2245_v51 }
 0x1f9   :  { %v576_v47 = vsel %vm204_vm0, %v506_v0, %v573_v52  ;;  %v2249_v52 = vld [vmem:[#allocation7 + $0xe0] sm:$0xff]  ;;  %v2263_v0 = vld [vmem:[#allocation7 + $0xc8] sm:$0xff] }
 0x1fa   :  { %867 = vmatpush.msra.mxu0 %v2249_v52 }
 0x1fd   :  { %v546_v48 = vpop.f32.mrf.mxu2  ;;  %v566_v62 = vpop.f32.mrf.mxu3 }
 0x1fe   :  { %v574_v55 = vrot.slane %v546_v48, 4  ;;  %v575_v56 = vrot.slane %v566_v62, 2  ;;  %v2251_v48 = vld [vmem:[#allocation7 + $0xe8] sm:$0xff]  ;;  %v2253_v62 = vld [vmem:[#allocation7 + $0xf0] sm:$0xff] }
 0x1ff   :  { %887 = vmatpush.msra.mxu1 %v2251_v48 }
 0x200   :  { %v577_v53 = vsel %vm206_vm1, %v574_v55, %v575_v56  ;;  %v2257_v55 = vld [vmem:[#allocation7 + $0xf8] sm:$0xff]  ;;  %v2261_v56 = vld [vmem:[#allocation7 + $0xc0] sm:$0xff] }
 0x201   :  { %v578_v54 = vsel %vm208_vm2, %v576_v47, %v577_v53  ;;  %927 = vmatpush.msra.mxu3 %v2257_v55  ;;  %868 = vmatpush.msra.mxu0 %v2261_v56  ;;  %v2269_v47 = vld [vmem:[#allocation7 + $0xd8] sm:$0xff]  ;;  %v2271_v53 = vld [vmem:[#allocation7 + $0xa0] sm:$0xff] }
 0x202   :  { %v580_v59 = vadd.f32 %v578_v54, %v424_v61  ;;  %v2265_v61 = vld [vmem:[#allocation7 + $0xd0] sm:$0xff]  ;;  %888 = vmatpush.msra.mxu1 %v2263_v0  ;;  %v2273_v54 = vld [vmem:[#allocation7 + $0xa8] sm:$0xff] }
 0x203   :  { %928 = vmatpush.msra.mxu3 %v2269_v47  ;;  %869 = vmatpush.msra.mxu0 %v2271_v53 }
 0x204   :  { %v581_v1 = vmul.f32 0.5, %v580_v59  ;;  %v586_v2 = vrot.slane %v580_v59, 2  ;;  %v595_v4 = vrot.slane %v580_v59, 6  ;;  %v592_v5 = vrot.slane %v580_v59, 4  ;;  %v2277_v59 = vld [vmem:[#allocation7 + $0xb0] sm:$0xff]  ;;  %889 = vmatpush.msra.mxu1 %v2273_v54 }
 0x206   :  { %1584 = vtanh.f32 %v581_v1  ;;  %v588_v3 = vmul.f32 0.5, %v586_v2  ;;  %v597_v6 = vmul.f32 0.5, %v595_v4  ;;  %v2279_v1 = vld [vmem:[#allocation7 + $0xb8] sm:$0xff]  ;;  %v2281_v2 = vld [vmem:[#allocation7 + $0x80] sm:$0xff]  ;;  %v2287_v4 = vld [vmem:[#allocation7 + $0x90] sm:$0xff] }
 0x207   :  { %2673 = vst [vmem:[#allocation17_spill] sm:$0xff] %v2279_v1  ;;  %929 = vmatpush.msra.mxu3 %v2279_v1  ;;  %870 = vmatpush.msra.mxu0 %v2281_v2 }
 0x208   :  { %1586 = vtanh.f32 %v588_v3  ;;  %2674 = vst [vmem:[#allocation13_spill] sm:$0xff] %v2281_v2  ;;  %v2285_v3 = vld [vmem:[#allocation7 + $0x88] sm:$0xff] }
 0x209   :  { %1588 = vtanh.f32 %v592_v5  ;;  %2675 = vst [vmem:[#allocation14_spill] sm:$0xff] %v2285_v3  ;;  %v2289_v5 = vld [vmem:[#allocation7 + $0x98] sm:$0xff]  ;;  %890 = vmatpush.msra.mxu1 %v2285_v3 }
 0x20a   :  { %1590 = vtanh.f32 %v597_v6  ;;  %2676 = vst [vmem:[#allocation21_spill] sm:$0xff] %v2287_v4  ;;  %v2293_v6 = vld [vmem:[#allocation7 + $0x60] sm:$0xff]  ;;  %930 = vmatpush.msra.mxu3 %v2289_v5 }
 0x20b   :  { %2677 = vst [vmem:[#allocation20_spill] sm:$0xff] %v2289_v5  ;;  %871 = vmatpush.msra.mxu0 %v2293_v6 }
 0x20c   :  { %v1585_v7 = vpop.eup %1584  ;;  %2678 = vst [vmem:[#allocation15_spill] sm:$0xff] %v2293_v6 }
 0x20d   :  { %v583_v8 = vmul.f32 0.5, %v1585_v7  ;;  %v2295_v7 = vld [vmem:[#allocation7 + $0x68] sm:$0xff] }
 0x20e   :  { %v1587_v9 = vpop.eup %1586  ;;  %2679 = vst [vmem:[#allocation16_spill] sm:$0xff] %v2295_v7  ;;  %891 = vmatpush.msra.mxu1 %v2295_v7 }
 0x20f   :  { %v584_v10 = vadd.f32 0.5, %v583_v8  ;;  %v590_v11 = vmul.f32 0.5, %v1587_v9  ;;  %v1589_v13 = vpop.eup %1588  ;;  %v2299_v8 = vld [vmem:[#allocation7 + $0x70] sm:$0xff]  ;;  %v2301_v9 = vld [vmem:[#allocation7 + $0x78] sm:$0xff] }
 0x210   :  { %v1591_v16 = vpop.eup %1590  ;;  %2680 = vst [vmem:[#allocation25_spill] sm:$0xff] %v2299_v8  ;;  %931 = vmatpush.msra.mxu3 %v2301_v9 }
 0x211   :  { %v591_v12 = vadd.f32 0.5, %v590_v11  ;;  %v602_v15 = vmul.f32 %v1589_v13, %v584_v10  ;;  %v599_v18 = vmul.f32 0.5, %v1591_v16  ;;  %2681 = vst [vmem:[#allocation24_spill] sm:$0xff] %v2301_v9  ;;  %v2305_v11 = vld [vmem:[#allocation7 + $0x40] sm:$0xff]  ;;  %v2311_v13 = vld [vmem:[#allocation7 + $0x50] sm:$0xff]  ;;  %v2319_v16 = vld [vmem:[#allocation7 + $0x28] sm:$0xff] }
 0x212   :  { %2682 = vst [vmem:[#allocation18_spill] sm:$0xff] %v2305_v11  ;;  %872 = vmatpush.msra.mxu0 %v2305_v11  ;;  %v2329_v9 = vld [vmem:[#allocation7] sm:$0xff]  ;;  %v2337_v11 = vld [vmem:[#allocation7 + $0x18] sm:$0xff] }
 0x213   :  { %v601_v14 = vmul.f32 %v591_v12, %v418_v50  ;;  %v600_v19 = vadd.f32 0.5, %v599_v18  ;;  %v2229_v50 = vld [vmem:[#allocation7 + $0x130] sm:$0xff]  ;;  %v2307_v12 = vld [vmem:[#allocation7 + $0x48] sm:$0xff]  ;;  %2684 = vst [vmem:[#allocation29_spill] sm:$0xff] %v2311_v13 }
 0x214   :  { %905 = vmatpush.msra.mxu2 %v2229_v50  ;;  %2683 = vst [vmem:[#allocation19_spill] sm:$0xff] %v2307_v12  ;;  %892 = vmatpush.msra.mxu1 %v2307_v12  ;;  %v2335_v12 = vld [vmem:[#allocation7 + $0x10] sm:$0xff] }
 0x215   :  { %v2150_v17 = vadd.f32 %v602_v15, %v601_v14  ;;  %v2313_v14 = vld [vmem:[#allocation7 + $0x58] sm:$0xff]  ;;  %v2317_v15 = vld [vmem:[#allocation7 + $0x20] sm:$0xff]  ;;  %2687 = vst [vmem:[#allocation23_spill] sm:$0xff] %v2319_v16 }
 0x216   :  { %906 = vmatpush.msra.mxu2 %v2241_v63  ;;  %2685 = vst [vmem:[#allocation28_spill] sm:$0xff] %v2313_v14  ;;  %932 = vmatpush.msra.mxu3 %v2313_v14 }
 0x217   :  { %1592 = vtanh.f32 %v2150_v17  ;;  %2686 = vst [vmem:[#allocation22_spill] sm:$0xff] %v2317_v15  ;;  %873 = vmatpush.msra.mxu0 %v2317_v15  ;;  %893 = vmatpush.msra.mxu1 %v2319_v16 }
 0x218   :  { %907 = vmatpush.msra.mxu2 %v2253_v62  ;;  %2690 = vst [vmem:[#allocation26_spill] sm:$0xff] %v2329_v9 }
 0x219   :  { %2692 = vst [vmem:[#allocation32_spill] sm:$0xff] %v2335_v12  ;;  %874 = vmatpush.msra.mxu0 %v2329_v9 }
 0x21a   :  { %908 = vmatpush.msra.mxu2 %v2265_v61  ;;  %2693 = vst [vmem:[#allocation33_spill] sm:$0xff] %v2337_v11 }
 0x21c   :  { %909 = vmatpush.msra.mxu2 %v2277_v59 }
 0x21d   :  { %v1593_v20 = vpop.eup %1592 }
 0x21e   :  { %v605_v21 = vmul.f32 %v1593_v20, %v600_v19  ;;  %910 = vmatpush.msra.mxu2 %v2287_v4  ;;  %v2323_v19 = vld [vmem:[#allocation7 + $0x30] sm:$0xff]  ;;  %v2325_v20 = vld [vmem:[#allocation7 + $0x38] sm:$0xff] }
 0x21f   :  { %2688 = vst [vmem:[#allocation31_spill] sm:$0xff] %v2323_v19  ;;  %v609_v4 = vld [vmem:[#allocation4 + $0x18] sm:$0xff]  ;;  %933 = vmatpush.msra.mxu3 %v2325_v20 }
 0x220   :  { %607 = vst [vmem:[#allocation9 + $0x4] sm:$0x3] %v605_v21  ;;  %690 = vmatmul.f32.vlgmr.msrb.gmra.mxu0 %v605_v21  ;;  %710 = vmatmul.f32.vlgmr.msrb.gmra.mxu1 %v605_v21 }
 0x221   :  { %730 = vmatmul.f32.vlgmr.msrb.gmra.mxu2 %v605_v21  ;;  %750 = vmatmul.f32.vlgmr.msrb.gmra.mxu3 %v605_v21  ;;  %2689 = vst [vmem:[#allocation30_spill] sm:$0xff] %v2325_v20 }
 0x222   :  { %911 = vmatpush.msra.mxu2 %v2299_v8  ;;  %v2331_v8 = vld [vmem:[#allocation7 + $0x8] sm:$0xff]  ;;  %934 = vmatpush.msra.mxu3 %v2337_v11 }
 0x223   :  { %2691 = vst [vmem:[#allocation27_spill] sm:$0xff] %v2331_v8  ;;  %894 = vmatpush.msra.mxu1 %v2331_v8  ;;  %1044 = vmatpush.msrb.mxu0 %v2153_v22 }
 0x224   :  { %912 = vmatpush.msra.mxu2 %v2311_v13  ;;  %1104 = vmatpush.msrb.mxu3 %v2161_v25 }
 0x225   :  { %1064 = vmatpush.msrb.mxu1 %v2155_v23  ;;  %1045 = vmatpush.msrb.mxu0 %v2165_v26 }
 0x226   :  { %913 = vmatpush.msra.mxu2 %v2323_v19  ;;  %1105 = vmatpush.msrb.mxu3 %v2173_v29 }
 0x227   :  { %1065 = vmatpush.msrb.mxu1 %v2167_v27  ;;  %1046 = vmatpush.msrb.mxu0 %v2177_v30 }
 0x228   :  { %914 = vmatpush.msra.mxu2 %v2335_v12  ;;  %1106 = vmatpush.msrb.mxu3 %v2185_v33 }
 0x229   :  { %1066 = vmatpush.msrb.mxu1 %v2179_v31  ;;  %1047 = vmatpush.msrb.mxu0 %v2189_v34 }
 0x22a   :  { %1084 = vmatpush.msrb.mxu2 %v2157_v24  ;;  %1107 = vmatpush.msrb.mxu3 %v2197_v37 }
 0x22b   :  { %1067 = vmatpush.msrb.mxu1 %v2191_v35  ;;  %1048 = vmatpush.msrb.mxu0 %v2201_v38 }
 0x22c   :  { %1085 = vmatpush.msrb.mxu2 %v2169_v28  ;;  %1108 = vmatpush.msrb.mxu3 %v2209_v41 }
 0x22d   :  { %1068 = vmatpush.msrb.mxu1 %v2203_v39  ;;  %1049 = vmatpush.msrb.mxu0 %v2213_v42 }
 0x22e   :  { %1086 = vmatpush.msrb.mxu2 %v2181_v32  ;;  %1109 = vmatpush.msrb.mxu3 %v2221_v45 }
 0x22f   :  { %1069 = vmatpush.msrb.mxu1 %v2215_v43  ;;  %1050 = vmatpush.msrb.mxu0 %v2225_v46 }
 0x230   :  { %1087 = vmatpush.msrb.mxu2 %v2193_v36  ;;  %1110 = vmatpush.msrb.mxu3 %v2233_v60 }
 0x231   :  { %1070 = vmatpush.msrb.mxu1 %v2227_v49  ;;  %1051 = vmatpush.msrb.mxu0 %v2237_v57 }
 0x232   :  { %1088 = vmatpush.msrb.mxu2 %v2205_v40  ;;  %1111 = vmatpush.msrb.mxu3 %v2245_v51 }
 0x233   :  { %1071 = vmatpush.msrb.mxu1 %v2239_v58  ;;  %1052 = vmatpush.msrb.mxu0 %v2249_v52 }
 0x234   :  { %1089 = vmatpush.msrb.mxu2 %v2217_v44  ;;  %1112 = vmatpush.msrb.mxu3 %v2257_v55 }
 0x235   :  { %1072 = vmatpush.msrb.mxu1 %v2251_v48  ;;  %1053 = vmatpush.msrb.mxu0 %v2261_v56 }
 0x236   :  { %1090 = vmatpush.msrb.mxu2 %v2229_v50  ;;  %1113 = vmatpush.msrb.mxu3 %v2269_v47 }
 0x237   :  { %1073 = vmatpush.msrb.mxu1 %v2263_v0  ;;  %1054 = vmatpush.msrb.mxu0 %v2271_v53 }
 0x238   :  { %1091 = vmatpush.msrb.mxu2 %v2241_v63  ;;  %1114 = vmatpush.msrb.mxu3 %v2279_v1  ;;  %v2703_v1 = vld [vmem:[#allocation29_spill] sm:$0xff] }
 0x239   :  { %1074 = vmatpush.msrb.mxu1 %v2273_v54  ;;  %1055 = vmatpush.msrb.mxu0 %v2281_v2 }
 0x23a   :  { %1092 = vmatpush.msrb.mxu2 %v2253_v62 }
 0x23b   :  { %1075 = vmatpush.msrb.mxu1 %v2285_v3  ;;  %v2704_v3 = vld [vmem:[#allocation28_spill] sm:$0xff] }
 0x23c   :  { %1093 = vmatpush.msrb.mxu2 %v2265_v61 }
 0x23e   :  { %1094 = vmatpush.msrb.mxu2 %v2277_v59 }
 0x29d   :  { %v711_v10 = vpop.f32.mrf.mxu1  ;;  %v691_v5 = vpop.f32.mrf.mxu0 }
 0x29e   :  { %v758_v18 = vrot.slane %v711_v10, 6 }
 0x2a0   :  { %v761_v14 = vsel %vm204_vm0, %v691_v5, %v758_v18 }
 0x2a4   :  { %v731_v21 = vpop.f32.mrf.mxu2  ;;  %v751_v7 = vpop.f32.mrf.mxu3 }
 0x2a5   :  { %v759_v6 = vrot.slane %v731_v21, 4  ;;  %v760_v10 = vrot.slane %v751_v7, 2 }
 0x2a7   :  { %v762_v13 = vsel %vm206_vm1, %v759_v6, %v760_v10 }
 0x2a8   :  { %v763_v7 = vsel %vm208_vm2, %v761_v14, %v762_v13 }
 0x2a9   :  { %v765_v21 = vadd.f32 %v763_v7, %v609_v4 }
 0x2ab   :  { %v766_v5 = vmul.f32 0.5, %v765_v21  ;;  %v771_v6 = vrot.slane %v765_v21, 2  ;;  %v780_v13 = vrot.slane %v765_v21, 6  ;;  %v777_v14 = vrot.slane %v765_v21, 4 }
 0x2ad   :  { %1594 = vtanh.f32 %v766_v5  ;;  %v773_v4 = vmul.f32 0.5, %v771_v6  ;;  %v782_v18 = vmul.f32 0.5, %v780_v13 }
 0x2af   :  { %1596 = vtanh.f32 %v773_v4 }
 0x2b0   :  { %1598 = vtanh.f32 %v777_v14 }
 0x2b1   :  { %1600 = vtanh.f32 %v782_v18 }
 0x2b3   :  { %v1595_v10 = vpop.eup %1594 }
 0x2b4   :  { %v768_v7 = vmul.f32 0.5, %v1595_v10 }
 0x2b5   :  { %v1597_v21 = vpop.eup %1596 }
 0x2b6   :  { %v769_v5 = vadd.f32 0.5, %v768_v7  ;;  %v775_v6 = vmul.f32 0.5, %v1597_v21  ;;  %v1599_v13 = vpop.eup %1598  ;;  %v2695_v21 = vld [vmem:[#allocation21_spill] sm:$0xff] }
 0x2b7   :  { %v1601_v10 = vpop.eup %1600  ;;  %1095 = vmatpush.msrb.mxu2 %v2695_v21 }
 0x2b8   :  { %v776_v4 = vadd.f32 0.5, %v775_v6  ;;  %v787_v18 = vmul.f32 %v1599_v13, %v769_v5  ;;  %v2696_v5 = vld [vmem:[#allocation20_spill] sm:$0xff]  ;;  %v2697_v6 = vld [vmem:[#allocation15_spill] sm:$0xff]  ;;  %v2699_v13 = vld [vmem:[#allocation25_spill] sm:$0xff] }
 0x2b9   :  { %1115 = vmatpush.msrb.mxu3 %v2696_v5  ;;  %1056 = vmatpush.msrb.mxu0 %v2697_v6 }
 0x2ba   :  { %v786_v14 = vmul.f32 %v776_v4, %v2150_v17  ;;  %v784_v17 = vmul.f32 0.5, %v1601_v10  ;;  %v2698_v4 = vld [vmem:[#allocation16_spill] sm:$0xff]  ;;  %1096 = vmatpush.msrb.mxu2 %v2699_v13  ;;  %v2702_v10 = vld [vmem:[#allocation19_spill] sm:$0xff] }
 0x2bb   :  { %1076 = vmatpush.msrb.mxu1 %v2698_v4 }
 0x2bc   :  { %v2387_v7 = vadd.f32 %v787_v18, %v786_v14  ;;  %v2700_v14 = vld [vmem:[#allocation24_spill] sm:$0xff]  ;;  %v785_v18 = vadd.f32 0.5, %v784_v17  ;;  %1097 = vmatpush.msrb.mxu2 %v2703_v1  ;;  %v2706_v17 = vld [vmem:[#allocation13_spill] sm:$0xff] }
 0x2bd   :  { %1116 = vmatpush.msrb.mxu3 %v2700_v14  ;;  %1077 = vmatpush.msrb.mxu1 %v2702_v10 }
 0x2be   :  { %2694 = vst [vmem:[#allocation34_spill] sm:$0xff] %v2387_v7  ;;  %1602 = vtanh.f32 %v2387_v7  ;;  %v2701_v7 = vld [vmem:[#allocation18_spill] sm:$0xff]  ;;  %1098 = vmatpush.msrb.mxu2 %v2323_v19 }
 0x2bf   :  { %1057 = vmatpush.msrb.mxu0 %v2701_v7  ;;  %1117 = vmatpush.msrb.mxu3 %v2704_v3 }
 0x2c0   :  { %1078 = vmatpush.msrb.mxu1 %v2319_v16  ;;  %1099 = vmatpush.msrb.mxu2 %v2335_v12 }
 0x2c1   :  { %1058 = vmatpush.msrb.mxu0 %v2317_v15  ;;  %1118 = vmatpush.msrb.mxu3 %v2325_v20 }
 0x2c2   :  { %1079 = vmatpush.msrb.mxu1 %v2331_v8 }
 0x2c3   :  { %1059 = vmatpush.msrb.mxu0 %v2329_v9  ;;  %1119 = vmatpush.msrb.mxu3 %v2337_v11 }
 0x2c4   :  { %v1603_v2 = vpop.eup %1602 }
 0x2c5   :  { %v790_v21 = vmul.f32 %v1603_v2, %v785_v18  ;;  %v2705_v2 = vld [vmem:[#allocation17_spill] sm:$0xff] }
 0x2c6   :  { %v2708_v18 = vld [vmem:[#allocation21_spill] sm:$0xff] }
 0x2c7   :  { %792 = vst [vmem:[#allocation9 + $0x6] sm:$0x3] %v790_v21  ;;  %875 = vmatmul.f32.vlgmr.msra.gmra.mxu0 %v790_v21  ;;  %895 = vmatmul.f32.vlgmr.msra.gmra.mxu1 %v790_v21 }
 0x2c8   :  { %915 = vmatmul.f32.vlgmr.msra.gmra.mxu2 %v790_v21  ;;  %935 = vmatmul.f32.vlgmr.msra.gmra.mxu3 %v790_v21  ;;  %v2707_v21 = vld [vmem:[#allocation14_spill] sm:$0xff] }
 0x2c9   :  { %1229 = vmatpush.msra.mxu0 %v2153_v22  ;;  %1249 = vmatpush.msra.mxu1 %v2155_v23 }
 0x2ca   :  { %1269 = vmatpush.msra.mxu2 %v2157_v24  ;;  %1289 = vmatpush.msra.mxu3 %v2161_v25 }
 0x2cb   :  { %1230 = vmatpush.msra.mxu0 %v2165_v26  ;;  %1250 = vmatpush.msra.mxu1 %v2167_v27 }
 0x2cc   :  { %1270 = vmatpush.msra.mxu2 %v2169_v28  ;;  %1290 = vmatpush.msra.mxu3 %v2173_v29 }
 0x2cd   :  { %1231 = vmatpush.msra.mxu0 %v2177_v30  ;;  %1251 = vmatpush.msra.mxu1 %v2179_v31 }
 0x2ce   :  { %1271 = vmatpush.msra.mxu2 %v2181_v32  ;;  %1291 = vmatpush.msra.mxu3 %v2185_v33 }
 0x2cf   :  { %1232 = vmatpush.msra.mxu0 %v2189_v34  ;;  %1252 = vmatpush.msra.mxu1 %v2191_v35 }
 0x2d0   :  { %1272 = vmatpush.msra.mxu2 %v2193_v36  ;;  %1292 = vmatpush.msra.mxu3 %v2197_v37 }
 0x2d1   :  { %1233 = vmatpush.msra.mxu0 %v2201_v38  ;;  %1253 = vmatpush.msra.mxu1 %v2203_v39 }
 0x2d2   :  { %1273 = vmatpush.msra.mxu2 %v2205_v40  ;;  %1293 = vmatpush.msra.mxu3 %v2209_v41 }
 0x2d3   :  { %1234 = vmatpush.msra.mxu0 %v2213_v42  ;;  %1254 = vmatpush.msra.mxu1 %v2215_v43 }
 0x2d4   :  { %1274 = vmatpush.msra.mxu2 %v2217_v44  ;;  %1294 = vmatpush.msra.mxu3 %v2221_v45 }
 0x2d5   :  { %1235 = vmatpush.msra.mxu0 %v2225_v46  ;;  %1255 = vmatpush.msra.mxu1 %v2227_v49 }
 0x2d6   :  { %1275 = vmatpush.msra.mxu2 %v2229_v50  ;;  %1295 = vmatpush.msra.mxu3 %v2233_v60 }
 0x2d7   :  { %1236 = vmatpush.msra.mxu0 %v2237_v57  ;;  %1256 = vmatpush.msra.mxu1 %v2239_v58 }
 0x2d8   :  { %1276 = vmatpush.msra.mxu2 %v2241_v63  ;;  %1296 = vmatpush.msra.mxu3 %v2245_v51 }
 0x2d9   :  { %1237 = vmatpush.msra.mxu0 %v2249_v52  ;;  %1257 = vmatpush.msra.mxu1 %v2251_v48 }
 0x2da   :  { %1277 = vmatpush.msra.mxu2 %v2253_v62  ;;  %1297 = vmatpush.msra.mxu3 %v2257_v55 }
 0x2db   :  { %1238 = vmatpush.msra.mxu0 %v2261_v56  ;;  %1258 = vmatpush.msra.mxu1 %v2263_v0 }
 0x2dc   :  { %1278 = vmatpush.msra.mxu2 %v2265_v61  ;;  %1298 = vmatpush.msra.mxu3 %v2269_v47 }
 0x2dd   :  { %1239 = vmatpush.msra.mxu0 %v2271_v53  ;;  %1259 = vmatpush.msra.mxu1 %v2273_v54 }
 0x2de   :  { %1279 = vmatpush.msra.mxu2 %v2277_v59  ;;  %1299 = vmatpush.msra.mxu3 %v2705_v2 }
 0x2df   :  { %1240 = vmatpush.msra.mxu0 %v2706_v17  ;;  %1260 = vmatpush.msra.mxu1 %v2707_v21 }
 0x2e0   :  { %1280 = vmatpush.msra.mxu2 %v2708_v18  ;;  %1300 = vmatpush.msra.mxu3 %v2696_v5 }
 0x2e1   :  { %1241 = vmatpush.msra.mxu0 %v2697_v6  ;;  %1261 = vmatpush.msra.mxu1 %v2698_v4 }
 0x2e2   :  { %1281 = vmatpush.msra.mxu2 %v2699_v13  ;;  %1301 = vmatpush.msra.mxu3 %v2700_v14 }
 0x2e3   :  { %1242 = vmatpush.msra.mxu0 %v2701_v7  ;;  %1262 = vmatpush.msra.mxu1 %v2702_v10 }
 0x2e4   :  { %1282 = vmatpush.msra.mxu2 %v2703_v1  ;;  %1302 = vmatpush.msra.mxu3 %v2704_v3 }
 0x2e5   :  { %1243 = vmatpush.msra.mxu0 %v2317_v15  ;;  %1263 = vmatpush.msra.mxu1 %v2319_v16  ;;  %v794_v16 = vld [vmem:[#allocation4 + $0x20] sm:$0xff] }
 0x2e6   :  { %1283 = vmatpush.msra.mxu2 %v2323_v19  ;;  %1303 = vmatpush.msra.mxu3 %v2325_v20 }
 0x2e7   :  { %1244 = vmatpush.msra.mxu0 %v2329_v9  ;;  %1264 = vmatpush.msra.mxu1 %v2331_v8 }
 0x2e8   :  { %1284 = vmatpush.msra.mxu2 %v2335_v12  ;;  %1304 = vmatpush.msra.mxu3 %v2337_v11 }
 0x344   :  { %v896_v10 = vpop.f32.mrf.mxu1  ;;  %v876_v13 = vpop.f32.mrf.mxu0 }
 0x345   :  { %v943_v1 = vrot.slane %v896_v10, 6 }
 0x347   :  { %v946_v19 = vsel %vm204_vm0, %v876_v13, %v943_v1  ;;  %v2709_v13 = vld [vmem:[#allocation34_spill] sm:$0xff] }
 0x34b   :  { %v916_v7 = vpop.f32.mrf.mxu2  ;;  %v936_v3 = vpop.f32.mrf.mxu3 }
 0x34c   :  { %v944_v14 = vrot.slane %v916_v7, 4  ;;  %v945_v15 = vrot.slane %v936_v3, 2 }
 0x34e   :  { %v947_v20 = vsel %vm206_vm1, %v944_v14, %v945_v15 }
 0x34f   :  { %v948_v9 = vsel %vm208_vm2, %v946_v19, %v947_v20 }
 0x350   :  { %v950_v4 = vadd.f32 %v948_v9, %v794_v16 }
 0x352   :  { %v951_v8 = vmul.f32 0.5, %v950_v4  ;;  %v956_v6 = vrot.slane %v950_v4, 2  ;;  %v965_v11 = vrot.slane %v950_v4, 6  ;;  %v962_v10 = vrot.slane %v950_v4, 4 }
 0x354   :  { %1604 = vtanh.f32 %v951_v8  ;;  %v958_v12 = vmul.f32 0.5, %v956_v6  ;;  %v967_v5 = vmul.f32 0.5, %v965_v11 }
 0x356   :  { %1606 = vtanh.f32 %v958_v12 }
 0x357   :  { %1608 = vtanh.f32 %v962_v10 }
 0x358   :  { %1610 = vtanh.f32 %v967_v5 }
 0x35a   :  { %v1605_v18 = vpop.eup %1604 }
 0x35b   :  { %v953_v3 = vmul.f32 0.5, %v1605_v18 }
 0x35c   :  { %v1607_v7 = vpop.eup %1606 }
 0x35d   :  { %v954_v21 = vadd.f32 0.5, %v953_v3  ;;  %v960_v17 = vmul.f32 0.5, %v1607_v7  ;;  %v1609_v15 = vpop.eup %1608 }
 0x35e   :  { %v1611_v16 = vpop.eup %1610 }
 0x35f   :  { %v961_v1 = vadd.f32 0.5, %v960_v17  ;;  %v972_v9 = vmul.f32 %v1609_v15, %v954_v21  ;;  %v969_v8 = vmul.f32 0.5, %v1611_v16 }
 0x361   :  { %v971_v19 = vmul.f32 %v961_v1, %v2709_v13  ;;  %v970_v12 = vadd.f32 0.5, %v969_v8  ;;  %v1164_v8 = vld [vmem:[#allocation4 + $0x30] sm:$0xff] }
 0x363   :  { %v2484_v20 = vadd.f32 %v972_v9, %v971_v19 }
 0x365   :  { %1612 = vtanh.f32 %v2484_v20 }
 0x36b   :  { %v1613_v11 = vpop.eup %1612 }
 0x36c   :  { %v975_v6 = vmul.f32 %v1613_v11, %v970_v12 }
 0x36e   :  { %977 = vst [vmem:[#allocation9 + $0x8] sm:$0x3] %v975_v6  ;;  %1060 = vmatmul.f32.vlgmr.msrb.gmra.mxu0 %v975_v6  ;;  %1080 = vmatmul.f32.vlgmr.msrb.gmra.mxu1 %v975_v6 }
 0x36f   :  { %1100 = vmatmul.f32.vlgmr.msrb.gmra.mxu2 %v975_v6  ;;  %1120 = vmatmul.f32.vlgmr.msrb.gmra.mxu3 %v975_v6 }
 0x370   :  { %1414 = vmatpush.msrb.mxu0 %v2153_v22  ;;  %1434 = vmatpush.msrb.mxu1 %v2155_v23  ;;  %v2710_v22 = vld [vmem:[#allocation13_spill] sm:$0xff]  ;;  %v2711_v23 = vld [vmem:[#allocation14_spill] sm:$0xff] }
 0x371   :  { %1454 = vmatpush.msrb.mxu2 %v2157_v24  ;;  %1474 = vmatpush.msrb.mxu3 %v2161_v25  ;;  %v2712_v24 = vld [vmem:[#allocation21_spill] sm:$0xff]  ;;  %v2713_v25 = vld [vmem:[#allocation20_spill] sm:$0xff] }
 0x372   :  { %1415 = vmatpush.msrb.mxu0 %v2165_v26  ;;  %1435 = vmatpush.msrb.mxu1 %v2167_v27  ;;  %v2714_v26 = vld [vmem:[#allocation15_spill] sm:$0xff]  ;;  %v2715_v27 = vld [vmem:[#allocation16_spill] sm:$0xff] }
 0x373   :  { %1455 = vmatpush.msrb.mxu2 %v2169_v28  ;;  %1475 = vmatpush.msrb.mxu3 %v2173_v29  ;;  %v2716_v28 = vld [vmem:[#allocation25_spill] sm:$0xff]  ;;  %v2717_v29 = vld [vmem:[#allocation24_spill] sm:$0xff] }
 0x374   :  { %1416 = vmatpush.msrb.mxu0 %v2177_v30  ;;  %1436 = vmatpush.msrb.mxu1 %v2179_v31  ;;  %v2718_v30 = vld [vmem:[#allocation18_spill] sm:$0xff]  ;;  %v2719_v31 = vld [vmem:[#allocation19_spill] sm:$0xff] }
 0x375   :  { %1456 = vmatpush.msrb.mxu2 %v2181_v32  ;;  %1476 = vmatpush.msrb.mxu3 %v2185_v33  ;;  %v2720_v32 = vld [vmem:[#allocation29_spill] sm:$0xff]  ;;  %v2721_v33 = vld [vmem:[#allocation28_spill] sm:$0xff] }
 0x376   :  { %1417 = vmatpush.msrb.mxu0 %v2189_v34  ;;  %1437 = vmatpush.msrb.mxu1 %v2191_v35  ;;  %v2722_v34 = vld [vmem:[#allocation22_spill] sm:$0xff]  ;;  %v2723_v35 = vld [vmem:[#allocation23_spill] sm:$0xff] }
 0x377   :  { %1457 = vmatpush.msrb.mxu2 %v2193_v36  ;;  %1477 = vmatpush.msrb.mxu3 %v2197_v37  ;;  %v2724_v36 = vld [vmem:[#allocation31_spill] sm:$0xff]  ;;  %v2725_v37 = vld [vmem:[#allocation30_spill] sm:$0xff] }
 0x378   :  { %1418 = vmatpush.msrb.mxu0 %v2201_v38  ;;  %1438 = vmatpush.msrb.mxu1 %v2203_v39  ;;  %v2726_v38 = vld [vmem:[#allocation26_spill] sm:$0xff]  ;;  %v2727_v39 = vld [vmem:[#allocation27_spill] sm:$0xff] }
 0x379   :  { %1458 = vmatpush.msrb.mxu2 %v2205_v40  ;;  %1478 = vmatpush.msrb.mxu3 %v2209_v41  ;;  %v2728_v40 = vld [vmem:[#allocation32_spill] sm:$0xff]  ;;  %v2729_v41 = vld [vmem:[#allocation33_spill] sm:$0xff] }
 0x37a   :  { %1419 = vmatpush.msrb.mxu0 %v2213_v42  ;;  %1439 = vmatpush.msrb.mxu1 %v2215_v43 }
 0x37b   :  { %1459 = vmatpush.msrb.mxu2 %v2217_v44  ;;  %1479 = vmatpush.msrb.mxu3 %v2221_v45 }
 0x37c   :  { %1420 = vmatpush.msrb.mxu0 %v2225_v46  ;;  %1440 = vmatpush.msrb.mxu1 %v2227_v49 }
 0x37d   :  { %1460 = vmatpush.msrb.mxu2 %v2229_v50  ;;  %1480 = vmatpush.msrb.mxu3 %v2233_v60  ;;  %v979_v60 = vld [vmem:[#allocation4 + $0x28] sm:$0xff] }
 0x37e   :  { %1421 = vmatpush.msrb.mxu0 %v2237_v57  ;;  %1441 = vmatpush.msrb.mxu1 %v2239_v58 }
 0x37f   :  { %1461 = vmatpush.msrb.mxu2 %v2241_v63  ;;  %1481 = vmatpush.msrb.mxu3 %v2245_v51 }
 0x380   :  { %1422 = vmatpush.msrb.mxu0 %v2249_v52  ;;  %1442 = vmatpush.msrb.mxu1 %v2251_v48 }
 0x381   :  { %1462 = vmatpush.msrb.mxu2 %v2253_v62  ;;  %1482 = vmatpush.msrb.mxu3 %v2257_v55 }
 0x382   :  { %1423 = vmatpush.msrb.mxu0 %v2261_v56  ;;  %1443 = vmatpush.msrb.mxu1 %v2263_v0 }
 0x383   :  { %1463 = vmatpush.msrb.mxu2 %v2265_v61  ;;  %1483 = vmatpush.msrb.mxu3 %v2269_v47 }
 0x384   :  { %1424 = vmatpush.msrb.mxu0 %v2271_v53  ;;  %1444 = vmatpush.msrb.mxu1 %v2273_v54 }
 0x385   :  { %1464 = vmatpush.msrb.mxu2 %v2277_v59  ;;  %1484 = vmatpush.msrb.mxu3 %v2705_v2 }
 0x386   :  { %1425 = vmatpush.msrb.mxu0 %v2710_v22  ;;  %1445 = vmatpush.msrb.mxu1 %v2711_v23 }
 0x387   :  { %1465 = vmatpush.msrb.mxu2 %v2712_v24  ;;  %1485 = vmatpush.msrb.mxu3 %v2713_v25 }
 0x388   :  { %1426 = vmatpush.msrb.mxu0 %v2714_v26  ;;  %1446 = vmatpush.msrb.mxu1 %v2715_v27 }
 0x389   :  { %1466 = vmatpush.msrb.mxu2 %v2716_v28  ;;  %1486 = vmatpush.msrb.mxu3 %v2717_v29 }
 0x38a   :  { %1427 = vmatpush.msrb.mxu0 %v2718_v30  ;;  %1447 = vmatpush.msrb.mxu1 %v2719_v31 }
 0x38b   :  { %1467 = vmatpush.msrb.mxu2 %v2720_v32  ;;  %1487 = vmatpush.msrb.mxu3 %v2721_v33 }
 0x38c   :  { %1428 = vmatpush.msrb.mxu0 %v2722_v34  ;;  %1448 = vmatpush.msrb.mxu1 %v2723_v35 }
 0x38d   :  { %1468 = vmatpush.msrb.mxu2 %v2724_v36  ;;  %1488 = vmatpush.msrb.mxu3 %v2725_v37 }
 0x38e   :  { %1429 = vmatpush.msrb.mxu0 %v2726_v38  ;;  %1449 = vmatpush.msrb.mxu1 %v2727_v39 }
 0x38f   :  { %1469 = vmatpush.msrb.mxu2 %v2728_v40  ;;  %1489 = vmatpush.msrb.mxu3 %v2729_v41 }
 0x3eb   :  { %v1081_v42 = vpop.f32.mrf.mxu1  ;;  %v1061_v50 = vpop.f32.mrf.mxu0 }
 0x3ec   :  { %v1128_v43 = vrot.slane %v1081_v42, 6 }
 0x3ee   :  { %v1131_v57 = vsel %vm204_vm0, %v1061_v50, %v1128_v43 }
 0x3f2   :  { %v1101_v44 = vpop.f32.mrf.mxu2  ;;  %v1121_v45 = vpop.f32.mrf.mxu3 }
 0x3f3   :  { %v1129_v46 = vrot.slane %v1101_v44, 4  ;;  %v1130_v49 = vrot.slane %v1121_v45, 2 }
 0x3f5   :  { %v1132_v58 = vsel %vm206_vm1, %v1129_v46, %v1130_v49 }
 0x3f6   :  { %v1133_v63 = vsel %vm208_vm2, %v1131_v57, %v1132_v58  ;;  %v1349_v58 = vld [vmem:[#allocation4 + $0x38] sm:$0xff] }
 0x3f7   :  { %v1135_v51 = vadd.f32 %v1133_v63, %v979_v60 }
 0x3f9   :  { %v1136_v52 = vmul.f32 0.5, %v1135_v51  ;;  %v1141_v48 = vrot.slane %v1135_v51, 2  ;;  %v1150_v55 = vrot.slane %v1135_v51, 6  ;;  %v1147_v56 = vrot.slane %v1135_v51, 4 }
 0x3fb   :  { %1614 = vtanh.f32 %v1136_v52  ;;  %v1143_v62 = vmul.f32 0.5, %v1141_v48  ;;  %v1152_v0 = vmul.f32 0.5, %v1150_v55 }
 0x3fd   :  { %1616 = vtanh.f32 %v1143_v62 }
 0x3fe   :  { %1618 = vtanh.f32 %v1147_v56 }
 0x3ff   :  { %1620 = vtanh.f32 %v1152_v0 }
 0x401   :  { %v1615_v61 = vpop.eup %1614 }
 0x402   :  { %v1138_v47 = vmul.f32 0.5, %v1615_v61 }
 0x403   :  { %v1617_v53 = vpop.eup %1616 }
 0x404   :  { %v1139_v54 = vadd.f32 0.5, %v1138_v47  ;;  %v1145_v59 = vmul.f32 0.5, %v1617_v53  ;;  %v1619_v4 = vpop.eup %1618 }
 0x405   :  { %v1621_v17 = vpop.eup %1620 }
 0x406   :  { %v1146_v5 = vadd.f32 0.5, %v1145_v59  ;;  %v1157_v2 = vmul.f32 %v1619_v4, %v1139_v54  ;;  %v1154_v18 = vmul.f32 0.5, %v1621_v17 }
 0x408   :  { %v1156_v14 = vmul.f32 %v1146_v5, %v2484_v20  ;;  %v1155_v10 = vadd.f32 0.5, %v1154_v18 }
 0x40a   :  { %v1158_v21 = vadd.f32 %v1157_v2, %v1156_v14 }
 0x40c   :  { %1622 = vtanh.f32 %v1158_v21 }
 0x412   :  { %v1623_v3 = vpop.eup %1622 }
 0x413   :  { %v1160_v7 = vmul.f32 %v1623_v3, %v1155_v10 }
 0x415   :  { %1162 = vst [vmem:[#allocation9 + $0xa] sm:$0x3] %v1160_v7  ;;  %1245 = vmatmul.f32.vlgmr.msra.gmra.mxu0 %v1160_v7  ;;  %1265 = vmatmul.f32.vlgmr.msra.gmra.mxu1 %v1160_v7 }
 0x416   :  { %1285 = vmatmul.f32.vlgmr.msra.gmra.mxu2 %v1160_v7  ;;  %1305 = vmatmul.f32.vlgmr.msra.gmra.mxu3 %v1160_v7 }
 0x492   :  { %v1266_v1 = vpop.f32.mrf.mxu1  ;;  %v1246_v20 = vpop.f32.mrf.mxu0 }
 0x493   :  { %v1313_v15 = vrot.slane %v1266_v1, 6 }
 0x495   :  { %v1316_v12 = vsel %vm204_vm0, %v1246_v20, %v1313_v15 }
 0x499   :  { %v1286_v13 = vpop.f32.mrf.mxu2  ;;  %v1306_v19 = vpop.f32.mrf.mxu3 }
 0x49a   :  { %v1314_v9 = vrot.slane %v1286_v13, 4  ;;  %v1315_v16 = vrot.slane %v1306_v19, 2 }
 0x49c   :  { %v1317_v11 = vsel %vm206_vm1, %v1314_v9, %v1315_v16 }
 0x49d   :  { %v1318_v6 = vsel %vm208_vm2, %v1316_v12, %v1317_v11 }
 0x49e   :  { %v1320_v22 = vadd.f32 %v1318_v6, %v1164_v8 }
 0x4a0   :  { %v1321_v23 = vmul.f32 0.5, %v1320_v22  ;;  %v1326_v24 = vrot.slane %v1320_v22, 2  ;;  %v1335_v26 = vrot.slane %v1320_v22, 6  ;;  %v1332_v27 = vrot.slane %v1320_v22, 4 }
 0x4a2   :  { %1624 = vtanh.f32 %v1321_v23  ;;  %v1328_v25 = vmul.f32 0.5, %v1326_v24  ;;  %v1337_v28 = vmul.f32 0.5, %v1335_v26 }
 0x4a4   :  { %1626 = vtanh.f32 %v1328_v25 }
 0x4a5   :  { %1628 = vtanh.f32 %v1332_v27 }
 0x4a6   :  { %1630 = vtanh.f32 %v1337_v28 }
 0x4a8   :  { %v1625_v29 = vpop.eup %1624 }
 0x4a9   :  { %v1323_v30 = vmul.f32 0.5, %v1625_v29 }
 0x4aa   :  { %v1627_v31 = vpop.eup %1626 }
 0x4ab   :  { %v1324_v32 = vadd.f32 0.5, %v1323_v30  ;;  %v1330_v33 = vmul.f32 0.5, %v1627_v31  ;;  %v1629_v35 = vpop.eup %1628 }
 0x4ac   :  { %v1631_v38 = vpop.eup %1630 }
 0x4ad   :  { %v1331_v34 = vadd.f32 0.5, %v1330_v33  ;;  %v1342_v37 = vmul.f32 %v1629_v35, %v1324_v32  ;;  %v1339_v40 = vmul.f32 0.5, %v1631_v38 }
 0x4af   :  { %v1341_v36 = vmul.f32 %v1331_v34, %v1158_v21  ;;  %v1340_v41 = vadd.f32 0.5, %v1339_v40 }
 0x4b1   :  { %v1343_v39 = vadd.f32 %v1342_v37, %v1341_v36 }
 0x4b3   :  { %1632 = vtanh.f32 %v1343_v39 }
 0x4b9   :  { %v1633_v42 = vpop.eup %1632 }
 0x4ba   :  { %v1345_v43 = vmul.f32 %v1633_v42, %v1340_v41 }
 0x4bc   :  { %1347 = vst [vmem:[#allocation9 + $0xc] sm:$0x3] %v1345_v43  ;;  %1430 = vmatmul.f32.vlgmr.msrb.gmra.mxu0 %v1345_v43  ;;  %1450 = vmatmul.f32.vlgmr.msrb.gmra.mxu1 %v1345_v43 }
 0x4bd   :  { %1470 = vmatmul.f32.vlgmr.msrb.gmra.mxu2 %v1345_v43  ;;  %1490 = vmatmul.f32.vlgmr.msrb.gmra.mxu3 %v1345_v43 }
 0x539   :  { %v1451_v44 = vpop.f32.mrf.mxu1  ;;  %v1431_v57 = vpop.f32.mrf.mxu0 }
 0x53a   :  { %v1498_v45 = vrot.slane %v1451_v44, 6 }
 0x53c   :  { %v1501_v63 = vsel %vm204_vm0, %v1431_v57, %v1498_v45 }
 0x540   :  { %v1471_v46 = vpop.f32.mrf.mxu2  ;;  %v1491_v49 = vpop.f32.mrf.mxu3 }
 0x541   :  { %v1499_v50 = vrot.slane %v1471_v46, 4  ;;  %v1500_v60 = vrot.slane %v1491_v49, 2 }
 0x543   :  { %v1502_v51 = vsel %vm206_vm1, %v1499_v50, %v1500_v60 }
 0x544   :  { %v1503_v52 = vsel %vm208_vm2, %v1501_v63, %v1502_v51 }
 0x545   :  { %v1505_v48 = vadd.f32 %v1503_v52, %v1349_v58 }
 0x547   :  { %v1506_v62 = vmul.f32 0.5, %v1505_v48  ;;  %v1511_v55 = vrot.slane %v1505_v48, 2  ;;  %v1520_v0 = vrot.slane %v1505_v48, 6  ;;  %v1517_v61 = vrot.slane %v1505_v48, 4 }
 0x549   :  { %1634 = vtanh.f32 %v1506_v62  ;;  %v1513_v56 = vmul.f32 0.5, %v1511_v55  ;;  %v1522_v47 = vmul.f32 0.5, %v1520_v0 }
 0x54b   :  { %1636 = vtanh.f32 %v1513_v56 }
 0x54c   :  { %1638 = vtanh.f32 %v1517_v61 }
 0x54d   :  { %1640 = vtanh.f32 %v1522_v47 }
 0x54f   :  { %v1635_v53 = vpop.eup %1634 }
 0x550   :  { %v1508_v54 = vmul.f32 0.5, %v1635_v53 }
 0x551   :  { %v1637_v59 = vpop.eup %1636 }
 0x552   :  { %v1509_v5 = vadd.f32 0.5, %v1508_v54  ;;  %v1515_v4 = vmul.f32 0.5, %v1637_v59  ;;  %v1639_v2 = vpop.eup %1638 }
 0x553   :  { %v1641_v18 = vpop.eup %1640 }
 0x554   :  { %v1516_v14 = vadd.f32 0.5, %v1515_v4  ;;  %v1527_v21 = vmul.f32 %v1639_v2, %v1509_v5  ;;  %v1524_v3 = vmul.f32 0.5, %v1641_v18 }
 0x556   :  { %v1526_v17 = vmul.f32 %v1516_v14, %v1343_v39  ;;  %v1525_v7 = vadd.f32 0.5, %v1524_v3 }
 0x558   :  { %v1528_v10 = vadd.f32 %v1527_v21, %v1526_v17 }
 0x55a   :  { %1642 = vtanh.f32 %v1528_v10  ;;  %1534 = vst [vmem:[#allocation3] sm:$0x3] %v1528_v10 }
 0x560   :  { %v1643_v1 = vpop.eup %1642 }
 0x561   :  { %v1530_v15 = vmul.f32 %v1643_v1, %v1525_v7 }
 0x563   :  { %1532 = vst [vmem:[#allocation9 + $0xe] sm:$0x3] %v1530_v15 }
 0x564   :  { %1533 = vst [vmem:[#allocation2] sm:$0x3] %v1530_v15  ;;  %1547 = dma.vmem_to_hbm [thread:$0]  %s1540_s1, 256, %s1542_s25, [#allocation6], %s1727_s22, %s1727_s22, %s1730_s26  }
 0x565   :  { %1720 = dma.done.wait [#allocation6], 256  }
 0x566   :  { %1721 = vsyncadd [#allocation6], 4294967040 }
 0x567   :  { %1552 = vsyncpa [#allocation5], 1 }
 0x568   :  { %1553 = vsyncpa [#allocation8], 1 }
 0x569   :  { %1554 = vsyncpa [#allocation6], 1 }

</bundles_post_ra>
